<compile_context>
chip_gen: v6e
topology: v6e:2x2x1
jax: 0.10.0
libtpu: 0.0.40
codegen_flags: <defaults>
</compile_context>

<pallas_src>
import functools

import jax
import jax.numpy as jnp
from jax import lax
from jax.experimental import pallas as pl
from jax.experimental.pallas import tpu as pltpu


def _round_up(x, m):
    return ((x + m - 1) // m) * m


# ---------------------------------------------------------------------------
# Fused 3-layer FCN kernel (one (batch, L-tile) grid step per invocation)
# ---------------------------------------------------------------------------
def _fcn_fused_kernel(x1_ref, w1_ref, b1_ref, w2_ref, b2_ref, w3_ref, b3_ref,
                      o_ref, h1_ref, h2_ref, *, seq_len):
    # x1_ref : (R1, K1*C_in)  im2col'd layer-1 input tile (halo rows included)
    # w1_ref : (K1*C_in, C1)  BN-folded layer-1 weight; b1_ref: (1, C1)
    # w2_ref : (K2, C1, C2);  b2_ref: (1, C2)
    # w3_ref : (K3, C2, C3);  b3_ref: (1, C3)
    # o_ref  : (C3, TL)       output tile written directly in NCW layout
    # h1_ref : (R1, C1) VMEM scratch;  h2_ref : (R2, C2) VMEM scratch
    R1 = h1_ref.shape[0]
    R2 = h2_ref.shape[0]
    TL = o_ref.shape[1]
    K2 = w2_ref.shape[0]
    K3 = w3_ref.shape[0]
    l3 = (K3 - 1) // 2
    hl23 = (K2 - 1) // 2 + l3            # combined left halo of layers 2+3

    s = pl.program_id(1) * TL            # first output position of this tile

    # ---- layer 1: single MXU matmul (im2col -> contraction K1*C_in) --------
    y1 = jnp.dot(x1_ref[...], w1_ref[...], preferred_element_type=jnp.float32)
    h1_ref[...] = jnp.maximum(y1 + b1_ref[...], 0.0).astype(h1_ref.dtype)

    # Replicate layer-1 output rows at the *global* sequence boundary so layer 2
    # sees exactly PyTorch's per-layer replicate padding.  Row j holds position
    # (s - hl23 + j); rows outside [0, seq_len) get the row of pos 0 / seq_len-1.
    lo1 = jnp.clip(hl23 - s, 0, R1 - 1)
    hi1 = jnp.clip(seq_len - 1 - s + hl23, 0, R1 - 1)

    @pl.when(jnp.logical_or(lo1 > 0, hi1 < R1 - 1))
    def _():
        rows = lax.broadcasted_iota(jnp.int32, (R1, 1), 0)
        lo_row = h1_ref[pl.ds(lo1, 1), :]
        hi_row = h1_ref[pl.ds(hi1, 1), :]
        h1_ref[...] = jnp.where(rows < lo1, lo_row,
                                jnp.where(rows > hi1, hi_row, h1_ref[...]))

    # ---- layer 2: K2 tap matmuls (contraction = C1), f32 accumulation ------
    acc2 = jnp.dot(h1_ref[pl.ds(0, R2), :], w2_ref[0],
                   preferred_element_type=jnp.float32)
    for k in range(1, K2):
        acc2 = acc2 + jnp.dot(h1_ref[pl.ds(k, R2), :], w2_ref[k],
                              preferred_element_type=jnp.float32)
    h2_ref[...] = jnp.maximum(acc2 + b2_ref[...], 0.0).astype(h2_ref.dtype)

    # Replicate layer-2 output rows at the global boundary (for layer 3).
    lo2 = jnp.clip(l3 - s, 0, R2 - 1)
    hi2 = jnp.clip(seq_len - 1 - s + l3, 0, R2 - 1)

    @pl.when(jnp.logical_or(lo2 > 0, hi2 < R2 - 1))
    def _():
        rows = lax.broadcasted_iota(jnp.int32, (R2, 1), 0)
        lo_row = h2_ref[pl.ds(lo2, 1), :]
        hi_row = h2_ref[pl.ds(hi2, 1), :]
        h2_ref[...] = jnp.where(rows < lo2, lo_row,
                                jnp.where(rows > hi2, hi_row, h2_ref[...]))

    # ---- layer 3: K3 tap matmuls (contraction = C2) -------------------------
    acc3 = jnp.dot(h2_ref[pl.ds(0, TL), :], w3_ref[0],
                   preferred_element_type=jnp.float32)
    for k in range(1, K3):
        acc3 = acc3 + jnp.dot(h2_ref[pl.ds(k, TL), :], w3_ref[k],
                              preferred_element_type=jnp.float32)
    y3 = jnp.maximum(acc3 + b3_ref[...], 0.0)
    # Store directly in NCW layout (channels on sublanes, L-tile on lanes) so the
    # wrapper never does an extra HBM transpose pass over the output.
    o_ref[...] = y3.astype(o_ref.dtype).T


# ---------------------------------------------------------------------------
# BN folding (eval mode) into conv weights / bias
# ---------------------------------------------------------------------------
def _fold_bn_into_conv(p, eps=1e-5):
    scale = p["gamma"] / jnp.sqrt(p["var"] + eps)      # (C_out,)
    w = p["w"] * scale[None, None, :]                   # (K, C_in, C_out)
    b = p["beta"] + (p["b"] - p["mean"]) * scale        # (C_out,)
    return w, b


# ---------------------------------------------------------------------------
# Forward pass (NCW in, NCW out — same as the PyTorch module)
# ---------------------------------------------------------------------------
@functools.partial(jax.jit, static_argnames=("tile_len", "compute_dtype"))
def fcn_feature_extractor(params, x_ncw, *, tile_len=512,
                          compute_dtype=jnp.float32):
    min_len = 5
    B, _, L = x_ncw.shape
    if L < min_len:
        # manual_pad: replicate the last timestep up to min_len (MILLET semantics)
        x_ncw = jnp.pad(x_ncw, ((0, 0), (0, 0), (0, min_len - L)), mode="edge")
        L = min_len

    (w1, b1), (w2, b2), (w3, b3) = [_fold_bn_into_conv(p) for p in params]
    K1, C_in, C1 = w1.shape
    K2, _, C2 = w2.shape
    K3, _, C3 = w3.shape
    l1 = (K1 - 1) // 2
    r1 = K1 - 1 - l1
    l2 = (K2 - 1) // 2
    r2 = K2 - 1 - l2
    l3 = (K3 - 1) // 2
    r3 = K3 - 1 - l3
    hl23, hr23 = l2 + l3, r2 + r3

    # --- L tiling: multiple of 128 when tiled (lane-dense output stores) -----
    tile_len = max(128, (tile_len // 128) * 128)
    L8 = _round_up(L, 8)
    TL = L8 if L8 <= tile_len else tile_len
    num_tiles = -(-L // TL)
    Lp = num_tiles * TL
    R1 = TL + hl23 + hr23        # layer-1 rows per tile (with halo)
    R2 = TL + l3 + r3            # layer-2 rows per tile (with halo)

    # --- replicate ('edge') pad the raw input + layer-1 im2col ---------------
    x = jnp.transpose(x_ncw, (0, 2, 1)).astype(jnp.float32)        # (B, L, C_in)
    x_pad = jnp.pad(x, ((0, 0), (l1 + hl23, (Lp - L) + r1 + hr23), (0, 0)),
                    mode="edge")
    n1 = Lp + hl23 + hr23
    X1 = jnp.concatenate([x_pad[:, k:k + n1, :] for k in range(K1)], axis=-1)
    # Stack overlapping halo'd tiles so plain BlockSpecs can double-buffer them.
    row_idx = (jnp.arange(num_tiles) * TL)[:, None] + jnp.arange(R1)[None, :]
    X1_tiles = X1[:, row_idx, :].astype(compute_dtype)   # (B, nt, R1, K1*C_in)

    w1m = w1.reshape(K1 * C_in, C1).astype(compute_dtype)
    w2c = w2.astype(compute_dtype)
    w3c = w3.astype(compute_dtype)
    b1r = b1.reshape(1, C1).astype(jnp.float32)
    b2r = b2.reshape(1, C2).astype(jnp.float32)
    b3r = b3.reshape(1, C3).astype(jnp.float32)

    kernel = functools.partial(_fcn_fused_kernel, seq_len=L)

    out = pl.pallas_call(
        kernel,
        out_shape=jax.ShapeDtypeStruct((B, C3, Lp), jnp.float32),
        grid_spec=pltpu.PrefetchScalarGridSpec(
            num_scalar_prefetch=0,
            grid=(B, num_tiles),
            in_specs=[
                pl.BlockSpec((None, None, R1, K1 * C_in),
                             lambda b, t: (b, t, 0, 0)),
                pl.BlockSpec((K1 * C_in, C1), lambda b, t: (0, 0)),
                pl.BlockSpec((1, C1), lambda b, t: (0, 0)),
                pl.BlockSpec((K2, C1, C2), lambda b, t: (0, 0, 0)),
                pl.BlockSpec((1, C2), lambda b, t: (0, 0)),
                pl.BlockSpec((K3, C2, C3), lambda b, t: (0, 0, 0)),
                pl.BlockSpec((1, C3), lambda b, t: (0, 0)),
            ],
            out_specs=pl.BlockSpec((None, C3, TL), lambda b, t: (b, 0, t)),
            scratch_shapes=[
                pltpu.VMEM((R1, C1), compute_dtype),
                pltpu.VMEM((R2, C2), compute_dtype),
            ],
        ),
        compiler_params=pltpu.CompilerParams(
            dimension_semantics=("parallel", "parallel")),
    )(X1_tiles, w1m, b1r, w2c, b2r, w3c, b3r)

    return out[:, :, :L]


# ---------------------------------------------------------------------------
# Parameter initialization (deterministic, PyTorch-shaped)
# ---------------------------------------------------------------------------
def _init_conv_block_params(key, c_in, c_out, k):
    kw, kb, kg, kbeta, km, kv = jax.random.split(key, 6)
    bound = 1.0 / jnp.sqrt(c_in * k)
    # PyTorch Conv1d weight layout is (C_out, C_in, K); we keep (K, C_in, C_out).
    w = jax.random.uniform(kw, (k, c_in, c_out), jnp.float32, -bound, bound)
    b = jax.random.uniform(kb, (c_out,), jnp.float32, -bound, bound)
    gamma = 1.0 + 0.1 * jax.random.normal(kg, (c_out,), jnp.float32)
    beta = 0.1 * jax.random.normal(kbeta, (c_out,), jnp.float32)
    running_mean = 0.1 * jax.random.normal(km, (c_out,), jnp.float32)
    running_var = 1.0 + 0.1 * jax.random.uniform(kv, (c_out,), jnp.float32)
    return dict(w=w, b=b, gamma=gamma, beta=beta, mean=running_mean, var=running_var)


def init_fcn_params(key, n_in_channels):
    k1, k2, k3 = jax.random.split(key, 3)
    return [
        _init_conv_block_params(k1, n_in_channels, 128, 8),
        _init_conv_block_params(k2, 128, 256, 5),
        _init_conv_block_params(k3, 256, 128, 3),
    ]


# ---------------------------------------------------------------------------
# Pure-JAX reference (per-layer replicate padding, exact PyTorch eval semantics)
# ---------------------------------------------------------------------------
def _ref_forward(params, x_ncw):
    min_len = 5
    if x_ncw.shape[-1] < min_len:
        x_ncw = jnp.pad(x_ncw, ((0, 0), (0, 0), (0, min_len - x_ncw.shape[-1])),
                        mode="edge")
    x = jnp.transpose(x_ncw, (0, 2, 1)).astype(jnp.float32)
    for p in params:
        K = p["w"].shape[0]
        left = (K - 1) // 2
        right = (K - 1) - left
        xp = jnp.pad(x, ((0, 0), (left, right), (0, 0)), mode="edge")
        L = x.shape[1]
        acc = jnp.zeros((x.shape[0], L, p["w"].shape[2]), jnp.float32)
        for k in range(K):
            acc = acc + jnp.einsum("blc,co->blo", xp[:, k:k + L, :], p["w"][k])
        scale = p["gamma"] / jnp.sqrt(p["var"] + 1e-5)
        shift = p["beta"] - p["mean"] * scale + p["b"] * scale
        x = jnp.maximum(acc * scale + shift, 0.0)
    return jnp.transpose(x, (0, 2, 1))


if __name__ == "__main__":
    key = jax.random.PRNGKey(0)
    kx, kp, kx2 = jax.random.split(key, 3)

    B, C_IN, L = 2, 4, 16  # small NCW input, consistent with Conv1d forward
    x = jax.random.normal(kx, (B, C_IN, L), jnp.float32)
    params = init_fcn_params(kp, C_IN)

    # f32 path (bit-for-bit PyTorch eval semantics up to f32 reassociation)
    out = jax.block_until_ready(fcn_feature_extractor(params, x))
    assert out.shape == (B, 128, L), out.shape
    ref = _ref_forward(params, x)
    assert jnp.allclose(out, ref, atol=1e-4, rtol=1e-4), float(
        jnp.max(jnp.abs(out - ref)))

    # bf16 MXU path (f32 accumulation) — looser tolerance
    out_bf = jax.block_until_ready(
        fcn_feature_extractor(params, x, compute_dtype=jnp.bfloat16))
    assert out_bf.shape == (B, 128, L)
    assert jnp.allclose(out_bf, ref, atol=5e-2, rtol=5e-2), float(
        jnp.max(jnp.abs(out_bf - ref)))

    # multi-tile path (partial last tile + interior tiles + boundary fix-ups)
    L2 = 300
    x2 = jax.random.normal(kx2, (B, C_IN, L2), jnp.float32)
    out2 = jax.block_until_ready(
        fcn_feature_extractor(params, x2, tile_len=128))
    ref2 = _ref_forward(params, x2)
    assert out2.shape == (B, 128, L2), out2.shape
    assert jnp.allclose(out2, ref2, atol=1e-4, rtol=1e-4), float(
        jnp.max(jnp.abs(out2 - ref2)))

    print("KERNEL_OK")
</pallas_src>

<mosaic_0001>
module attributes {stable_mosaic.version = 11 : i64} {
  func.func @_fcn_fused_kernel(%arg0: i32, %arg1: i32, %arg2: memref<1x1x22x32xf32, #tpu.memory_space<vmem>>, %arg3: memref<32x128xf32, #tpu.memory_space<vmem>>, %arg4: memref<1x128xf32, #tpu.memory_space<vmem>>, %arg5: memref<5x128x256xf32, #tpu.memory_space<vmem>>, %arg6: memref<1x256xf32, #tpu.memory_space<vmem>>, %arg7: memref<3x256x128xf32, #tpu.memory_space<vmem>>, %arg8: memref<1x128xf32, #tpu.memory_space<vmem>>, %arg9: memref<1x128x16xf32, #tpu.memory_space<vmem>>, %arg10: memref<22x128xf32, #tpu.memory_space<vmem>>, %arg11: memref<18x256xf32, #tpu.memory_space<vmem>>) attributes {dimension_semantics = [#tpu.dimension_semantics<parallel>, #tpu.dimension_semantics<parallel>], iteration_bounds = array<i64: 2, 1>, scalar_prefetch = 0 : i64, scratch_operands = 2 : i64, tpu.core_type = #tpu.core_type<tc>, window_params = [{transform_indices = @transform_0, window_bounds = array<i64: 1, 1, 22, 32>}, {pipeline_mode = #tpu.pipeline_mode<synchronous>, transform_indices = @transform_1, window_bounds = array<i64: 32, 128>}, {pipeline_mode = #tpu.pipeline_mode<synchronous>, transform_indices = @transform_2, window_bounds = array<i64: 1, 128>}, {pipeline_mode = #tpu.pipeline_mode<synchronous>, transform_indices = @transform_3, window_bounds = array<i64: 5, 128, 256>}, {pipeline_mode = #tpu.pipeline_mode<synchronous>, transform_indices = @transform_4, window_bounds = array<i64: 1, 256>}, {pipeline_mode = #tpu.pipeline_mode<synchronous>, transform_indices = @transform_5, window_bounds = array<i64: 3, 256, 128>}, {pipeline_mode = #tpu.pipeline_mode<synchronous>, transform_indices = @transform_6, window_bounds = array<i64: 1, 128>}, {transform_indices = @transform_7, window_bounds = array<i64: 1, 128, 16>}]} {
    %c16_i32 = arith.constant 16 : i32
    %0 = arith.muli %arg1, %c16_i32 : i32
    %c0 = arith.constant 0 : index
    %c0_0 = arith.constant 0 : index
    %c0_1 = arith.constant 0 : index
    %c0_2 = arith.constant 0 : index
    %1 = vector.load %arg2[%c0, %c0_0, %c0_1, %c0_2] : memref<1x1x22x32xf32, #tpu.memory_space<vmem>>, vector<1x1x22x32xf32>
    %2 = vector.shape_cast %1 : vector<1x1x22x32xf32> to vector<22x32xf32>
    %c0_3 = arith.constant 0 : index
    %c0_4 = arith.constant 0 : index
    %3 = vector.load %arg3[%c0_3, %c0_4] : memref<32x128xf32, #tpu.memory_space<vmem>>, vector<32x128xf32>
    %cst = arith.constant dense<0.000000e+00> : vector<22x128xf32>
    %4 = tpu.matmul %2, %3, %cst {dimension_numbers = #tpu.dot_dimension_numbers<[1], [0], [0], [1], [0, 0, 1, 1], [], []>} : vector<22x32xf32>, vector<32x128xf32>, vector<22x128xf32> -> vector<22x128xf32>
    %c0_5 = arith.constant 0 : index
    %c0_6 = arith.constant 0 : index
    %5 = vector.load %arg4[%c0_5, %c0_6] : memref<1x128xf32, #tpu.memory_space<vmem>>, vector<1x128xf32>
    %6 = vector.broadcast %5 : vector<1x128xf32> to vector<22x128xf32>
    %7 = arith.addf %4, %6 : vector<22x128xf32>
    %cst_7 = arith.constant 0.000000e+00 : f32
    %8 = vector.broadcast %cst_7 : f32 to vector<22x128xf32>
    %9 = arith.maximumf %7, %8 : vector<22x128xf32>
    %c0_8 = arith.constant 0 : index
    %c0_9 = arith.constant 0 : index
    %10 = vector.load %arg10[%c0_8, %c0_9] : memref<22x128xf32, #tpu.memory_space<vmem>>, vector<22x128xf32>
    tpu.vector_store %arg10[%c0_8, %c0_9], %9 {strides = array<i32>} : memref<22x128xf32, #tpu.memory_space<vmem>>, vector<22x128xf32>,
    %c3_i32 = arith.constant 3 : i32
    %11 = arith.subi %c3_i32, %0 : i32
    %c0_i32 = arith.constant 0 : i32
    %c21_i32 = arith.constant 21 : i32
    %12 = arith.maxsi %c0_i32, %11 : i32
    %13 = arith.minsi %c21_i32, %12 : i32
    %c15_i32 = arith.constant 15 : i32
    %14 = arith.subi %c15_i32, %0 : i32
    %c3_i32_10 = arith.constant 3 : i32
    %15 = arith.addi %14, %c3_i32_10 : i32
    %c0_i32_11 = arith.constant 0 : i32
    %c21_i32_12 = arith.constant 21 : i32
    %16 = arith.maxsi %c0_i32_11, %15 : i32
    %17 = arith.minsi %c21_i32_12, %16 : i32
    %c0_i32_13 = arith.constant 0 : i32
    %18 = arith.cmpi sgt, %13, %c0_i32_13 : i32
    %c21_i32_14 = arith.constant 21 : i32
    %19 = arith.cmpi slt, %17, %c21_i32_14 : i32
    %20 = arith.ori %18, %19 : i1
    %21 = arith.extui %20 : i1 to i32
    %c0_i32_15 = arith.constant 0 : i32
    %22 = arith.cmpi ne, %21, %c0_i32_15 : i32
    scf.if %22 {
      %88 = tpu.iota {dimensions = array<i32: 0>} : vector<22x1xi32>
      %89 = arith.index_cast %13 : i32 to index
      %c0_79 = arith.constant 0 : index
      %90 = vector.load %arg10[%89, %c0_79] : memref<22x128xf32, #tpu.memory_space<vmem>>, vector<1x128xf32>
      %91 = arith.index_cast %17 : i32 to index
      %c0_80 = arith.constant 0 : index
      %92 = vector.load %arg10[%91, %c0_80] : memref<22x128xf32, #tpu.memory_space<vmem>>, vector<1x128xf32>
      %93 = vector.broadcast %13 : i32 to vector<22x1xi32>
      %94 = arith.cmpi slt, %88, %93 : vector<22x1xi32>
      %95 = vector.broadcast %17 : i32 to vector<22x1xi32>
      %96 = arith.cmpi sgt, %88, %95 : vector<22x1xi32>
      %c0_81 = arith.constant 0 : index
      %c0_82 = arith.constant 0 : index
      %97 = vector.load %arg10[%c0_81, %c0_82] : memref<22x128xf32, #tpu.memory_space<vmem>>, vector<22x128xf32>
      %98 = vector.shape_cast %96 : vector<22x1xi1> to vector<22x1xi1>
      %99 = vector.broadcast %98 : vector<22x1xi1> to vector<22x128xi1>
      %100 = vector.shape_cast %92 : vector<1x128xf32> to vector<1x128xf32>
      %101 = vector.broadcast %100 : vector<1x128xf32> to vector<22x128xf32>
      %102 = arith.select %99, %101, %97 : vector<22x128xi1>, vector<22x128xf32>
      %103 = vector.shape_cast %94 : vector<22x1xi1> to vector<22x1xi1>
      %104 = vector.broadcast %103 : vector<22x1xi1> to vector<22x128xi1>
      %105 = vector.shape_cast %90 : vector<1x128xf32> to vector<1x128xf32>
      %106 = vector.broadcast %105 : vector<1x128xf32> to vector<22x128xf32>
      %107 = arith.select %104, %106, %102 : vector<22x128xi1>, vector<22x128xf32>
      %c0_83 = arith.constant 0 : index
      %c0_84 = arith.constant 0 : index
      %108 = vector.load %arg10[%c0_83, %c0_84] : memref<22x128xf32, #tpu.memory_space<vmem>>, vector<22x128xf32>
      tpu.vector_store %arg10[%c0_83, %c0_84], %107 {strides = array<i32>} : memref<22x128xf32, #tpu.memory_space<vmem>>, vector<22x128xf32>,
    } else {
    }
    %c0_16 = arith.constant 0 : index
    %c0_17 = arith.constant 0 : index
    %23 = vector.load %arg10[%c0_16, %c0_17] : memref<22x128xf32, #tpu.memory_space<vmem>>, vector<18x128xf32>
    %c0_18 = arith.constant 0 : index
    %c0_19 = arith.constant 0 : index
    %c0_20 = arith.constant 0 : index
    %24 = vector.load %arg5[%c0_18, %c0_19, %c0_20] : memref<5x128x256xf32, #tpu.memory_space<vmem>>, vector<1x128x256xf32>
    %25 = vector.shape_cast %24 : vector<1x128x256xf32> to vector<128x256xf32>
    %cst_21 = arith.constant dense<0.000000e+00> : vector<18x256xf32>
    %26 = tpu.matmul %23, %25, %cst_21 {dimension_numbers = #tpu.dot_dimension_numbers<[1], [0], [0], [1], [0, 0, 1, 1], [], []>} : vector<18x128xf32>, vector<128x256xf32>, vector<18x256xf32> -> vector<18x256xf32>
    %c1 = arith.constant 1 : index
    %c0_22 = arith.constant 0 : index
    %27 = vector.load %arg10[%c1, %c0_22] : memref<22x128xf32, #tpu.memory_space<vmem>>, vector<18x128xf32>
    %c1_23 = arith.constant 1 : index
    %c0_24 = arith.constant 0 : index
    %c0_25 = arith.constant 0 : index
    %28 = vector.load %arg5[%c1_23, %c0_24, %c0_25] : memref<5x128x256xf32, #tpu.memory_space<vmem>>, vector<1x128x256xf32>
    %29 = vector.shape_cast %28 : vector<1x128x256xf32> to vector<128x256xf32>
    %cst_26 = arith.constant dense<0.000000e+00> : vector<18x256xf32>
    %30 = tpu.matmul %27, %29, %cst_26 {dimension_numbers = #tpu.dot_dimension_numbers<[1], [0], [0], [1], [0, 0, 1, 1], [], []>} : vector<18x128xf32>, vector<128x256xf32>, vector<18x256xf32> -> vector<18x256xf32>
    %31 = arith.addf %26, %30 : vector<18x256xf32>
    %c2 = arith.constant 2 : index
    %c0_27 = arith.constant 0 : index
    %32 = vector.load %arg10[%c2, %c0_27] : memref<22x128xf32, #tpu.memory_space<vmem>>, vector<18x128xf32>
    %c2_28 = arith.constant 2 : index
    %c0_29 = arith.constant 0 : index
    %c0_30 = arith.constant 0 : index
    %33 = vector.load %arg5[%c2_28, %c0_29, %c0_30] : memref<5x128x256xf32, #tpu.memory_space<vmem>>, vector<1x128x256xf32>
    %34 = vector.shape_cast %33 : vector<1x128x256xf32> to vector<128x256xf32>
    %cst_31 = arith.constant dense<0.000000e+00> : vector<18x256xf32>
    %35 = tpu.matmul %32, %34, %cst_31 {dimension_numbers = #tpu.dot_dimension_numbers<[1], [0], [0], [1], [0, 0, 1, 1], [], []>} : vector<18x128xf32>, vector<128x256xf32>, vector<18x256xf32> -> vector<18x256xf32>
    %36 = arith.addf %31, %35 : vector<18x256xf32>
    %c3 = arith.constant 3 : index
    %c0_32 = arith.constant 0 : index
    %37 = vector.load %arg10[%c3, %c0_32] : memref<22x128xf32, #tpu.memory_space<vmem>>, vector<18x128xf32>
    %c3_33 = arith.constant 3 : index
    %c0_34 = arith.constant 0 : index
    %c0_35 = arith.constant 0 : index
    %38 = vector.load %arg5[%c3_33, %c0_34, %c0_35] : memref<5x128x256xf32, #tpu.memory_space<vmem>>, vector<1x128x256xf32>
    %39 = vector.shape_cast %38 : vector<1x128x256xf32> to vector<128x256xf32>
    %cst_36 = arith.constant dense<0.000000e+00> : vector<18x256xf32>
    %40 = tpu.matmul %37, %39, %cst_36 {dimension_numbers = #tpu.dot_dimension_numbers<[1], [0], [0], [1], [0, 0, 1, 1], [], []>} : vector<18x128xf32>, vector<128x256xf32>, vector<18x256xf32> -> vector<18x256xf32>
    %41 = arith.addf %36, %40 : vector<18x256xf32>
    %c4 = arith.constant 4 : index
    %c0_37 = arith.constant 0 : index
    %42 = vector.load %arg10[%c4, %c0_37] : memref<22x128xf32, #tpu.memory_space<vmem>>, vector<18x128xf32>
    %c4_38 = arith.constant 4 : index
    %c0_39 = arith.constant 0 : index
    %c0_40 = arith.constant 0 : index
    %43 = vector.load %arg5[%c4_38, %c0_39, %c0_40] : memref<5x128x256xf32, #tpu.memory_space<vmem>>, vector<1x128x256xf32>
    %44 = vector.shape_cast %43 : vector<1x128x256xf32> to vector<128x256xf32>
    %cst_41 = arith.constant dense<0.000000e+00> : vector<18x256xf32>
    %45 = tpu.matmul %42, %44, %cst_41 {dimension_numbers = #tpu.dot_dimension_numbers<[1], [0], [0], [1], [0, 0, 1, 1], [], []>} : vector<18x128xf32>, vector<128x256xf32>, vector<18x256xf32> -> vector<18x256xf32>
    %46 = arith.addf %41, %45 : vector<18x256xf32>
    %c0_42 = arith.constant 0 : index
    %c0_43 = arith.constant 0 : index
    %47 = vector.load %arg6[%c0_42, %c0_43] : memref<1x256xf32, #tpu.memory_space<vmem>>, vector<1x256xf32>
    %48 = vector.broadcast %47 : vector<1x256xf32> to vector<18x256xf32>
    %49 = arith.addf %46, %48 : vector<18x256xf32>
    %cst_44 = arith.constant 0.000000e+00 : f32
    %50 = vector.broadcast %cst_44 : f32 to vector<18x256xf32>
    %51 = arith.maximumf %49, %50 : vector<18x256xf32>
    %c0_45 = arith.constant 0 : index
    %c0_46 = arith.constant 0 : index
    %52 = vector.load %arg11[%c0_45, %c0_46] : memref<18x256xf32, #tpu.memory_space<vmem>>, vector<18x256xf32>
    tpu.vector_store %arg11[%c0_45, %c0_46], %51 {strides = array<i32>} : memref<18x256xf32, #tpu.memory_space<vmem>>, vector<18x256xf32>,
    %c1_i32 = arith.constant 1 : i32
    %53 = arith.subi %c1_i32, %0 : i32
    %c0_i32_47 = arith.constant 0 : i32
    %c17_i32 = arith.constant 17 : i32
    %54 = arith.maxsi %c0_i32_47, %53 : i32
    %55 = arith.minsi %c17_i32, %54 : i32
    %c15_i32_48 = arith.constant 15 : i32
    %56 = arith.subi %c15_i32_48, %0 : i32
    %c1_i32_49 = arith.constant 1 : i32
    %57 = arith.addi %56, %c1_i32_49 : i32
    %c0_i32_50 = arith.constant 0 : i32
    %c17_i32_51 = arith.constant 17 : i32
    %58 = arith.maxsi %c0_i32_50, %57 : i32
    %59 = arith.minsi %c17_i32_51, %58 : i32
    %c0_i32_52 = arith.constant 0 : i32
    %60 = arith.cmpi sgt, %55, %c0_i32_52 : i32
    %c17_i32_53 = arith.constant 17 : i32
    %61 = arith.cmpi slt, %59, %c17_i32_53 : i32
    %62 = arith.ori %60, %61 : i1
    %63 = arith.extui %62 : i1 to i32
    %c0_i32_54 = arith.constant 0 : i32
    %64 = arith.cmpi ne, %63, %c0_i32_54 : i32
    scf.if %64 {
      %88 = tpu.iota {dimensions = array<i32: 0>} : vector<18x1xi32>
      %89 = arith.index_cast %55 : i32 to index
      %c0_79 = arith.constant 0 : index
      %90 = vector.load %arg11[%89, %c0_79] : memref<18x256xf32, #tpu.memory_space<vmem>>, vector<1x256xf32>
      %91 = arith.index_cast %59 : i32 to index
      %c0_80 = arith.constant 0 : index
      %92 = vector.load %arg11[%91, %c0_80] : memref<18x256xf32, #tpu.memory_space<vmem>>, vector<1x256xf32>
      %93 = vector.broadcast %55 : i32 to vector<18x1xi32>
      %94 = arith.cmpi slt, %88, %93 : vector<18x1xi32>
      %95 = vector.broadcast %59 : i32 to vector<18x1xi32>
      %96 = arith.cmpi sgt, %88, %95 : vector<18x1xi32>
      %c0_81 = arith.constant 0 : index
      %c0_82 = arith.constant 0 : index
      %97 = vector.load %arg11[%c0_81, %c0_82] : memref<18x256xf32, #tpu.memory_space<vmem>>, vector<18x256xf32>
      %98 = vector.shape_cast %96 : vector<18x1xi1> to vector<18x1xi1>
      %99 = vector.broadcast %98 : vector<18x1xi1> to vector<18x256xi1>
      %100 = vector.shape_cast %92 : vector<1x256xf32> to vector<1x256xf32>
      %101 = vector.broadcast %100 : vector<1x256xf32> to vector<18x256xf32>
      %102 = arith.select %99, %101, %97 : vector<18x256xi1>, vector<18x256xf32>
      %103 = vector.shape_cast %94 : vector<18x1xi1> to vector<18x1xi1>
      %104 = vector.broadcast %103 : vector<18x1xi1> to vector<18x256xi1>
      %105 = vector.shape_cast %90 : vector<1x256xf32> to vector<1x256xf32>
      %106 = vector.broadcast %105 : vector<1x256xf32> to vector<18x256xf32>
      %107 = arith.select %104, %106, %102 : vector<18x256xi1>, vector<18x256xf32>
      %c0_83 = arith.constant 0 : index
      %c0_84 = arith.constant 0 : index
      %108 = vector.load %arg11[%c0_83, %c0_84] : memref<18x256xf32, #tpu.memory_space<vmem>>, vector<18x256xf32>
      tpu.vector_store %arg11[%c0_83, %c0_84], %107 {strides = array<i32>} : memref<18x256xf32, #tpu.memory_space<vmem>>, vector<18x256xf32>,
    } else {
    }
    %c0_55 = arith.constant 0 : index
    %c0_56 = arith.constant 0 : index
    %65 = vector.load %arg11[%c0_55, %c0_56] : memref<18x256xf32, #tpu.memory_space<vmem>>, vector<16x256xf32>
    %c0_57 = arith.constant 0 : index
    %c0_58 = arith.constant 0 : index
    %c0_59 = arith.constant 0 : index
    %66 = vector.load %arg7[%c0_57, %c0_58, %c0_59] : memref<3x256x128xf32, #tpu.memory_space<vmem>>, vector<1x256x128xf32>
    %67 = vector.shape_cast %66 : vector<1x256x128xf32> to vector<256x128xf32>
    %cst_60 = arith.constant dense<0.000000e+00> : vector<16x128xf32>
    %68 = tpu.matmul %65, %67, %cst_60 {dimension_numbers = #tpu.dot_dimension_numbers<[1], [0], [0], [1], [0, 0, 1, 1], [], []>} : vector<16x256xf32>, vector<256x128xf32>, vector<16x128xf32> -> vector<16x128xf32>
    %c1_61 = arith.constant 1 : index
    %c0_62 = arith.constant 0 : index
    %69 = vector.load %arg11[%c1_61, %c0_62] : memref<18x256xf32, #tpu.memory_space<vmem>>, vector<16x256xf32>
    %c1_63 = arith.constant 1 : index
    %c0_64 = arith.constant 0 : index
    %c0_65 = arith.constant 0 : index
    %70 = vector.load %arg7[%c1_63, %c0_64, %c0_65] : memref<3x256x128xf32, #tpu.memory_space<vmem>>, vector<1x256x128xf32>
    %71 = vector.shape_cast %70 : vector<1x256x128xf32> to vector<256x128xf32>
    %cst_66 = arith.constant dense<0.000000e+00> : vector<16x128xf32>
    %72 = tpu.matmul %69, %71, %cst_66 {dimension_numbers = #tpu.dot_dimension_numbers<[1], [0], [0], [1], [0, 0, 1, 1], [], []>} : vector<16x256xf32>, vector<256x128xf32>, vector<16x128xf32> -> vector<16x128xf32>
    %73 = arith.addf %68, %72 : vector<16x128xf32>
    %c2_67 = arith.constant 2 : index
    %c0_68 = arith.constant 0 : index
    %74 = vector.load %arg11[%c2_67, %c0_68] : memref<18x256xf32, #tpu.memory_space<vmem>>, vector<16x256xf32>
    %c2_69 = arith.constant 2 : index
    %c0_70 = arith.constant 0 : index
    %c0_71 = arith.constant 0 : index
    %75 = vector.load %arg7[%c2_69, %c0_70, %c0_71] : memref<3x256x128xf32, #tpu.memory_space<vmem>>, vector<1x256x128xf32>
    %76 = vector.shape_cast %75 : vector<1x256x128xf32> to vector<256x128xf32>
    %cst_72 = arith.constant dense<0.000000e+00> : vector<16x128xf32>
    %77 = tpu.matmul %74, %76, %cst_72 {dimension_numbers = #tpu.dot_dimension_numbers<[1], [0], [0], [1], [0, 0, 1, 1], [], []>} : vector<16x256xf32>, vector<256x128xf32>, vector<16x128xf32> -> vector<16x128xf32>
    %78 = arith.addf %73, %77 : vector<16x128xf32>
    %c0_73 = arith.constant 0 : index
    %c0_74 = arith.constant 0 : index
    %79 = vector.load %arg8[%c0_73, %c0_74] : memref<1x128xf32, #tpu.memory_space<vmem>>, vector<1x128xf32>
    %80 = vector.broadcast %79 : vector<1x128xf32> to vector<16x128xf32>
    %81 = arith.addf %78, %80 : vector<16x128xf32>
    %cst_75 = arith.constant 0.000000e+00 : f32
    %82 = vector.broadcast %cst_75 : f32 to vector<16x128xf32>
    %83 = arith.maximumf %81, %82 : vector<16x128xf32>
    %84 = tpu.transpose %83, [1, 0] : vector<16x128xf32> -> vector<128x16xf32>
    %c0_76 = arith.constant 0 : index
    %c0_77 = arith.constant 0 : index
    %c0_78 = arith.constant 0 : index
    %85 = vector.load %arg9[%c0_76, %c0_77, %c0_78] : memref<1x128x16xf32, #tpu.memory_space<vmem>>, vector<1x128x16xf32>
    %86 = vector.shape_cast %85 : vector<1x128x16xf32> to vector<128x16xf32>
    %87 = vector.shape_cast %84 : vector<128x16xf32> to vector<1x128x16xf32>
    tpu.vector_store %arg9[%c0_76, %c0_77, %c0_78], %87 {strides = array<i32>} : memref<1x128x16xf32, #tpu.memory_space<vmem>>, vector<1x128x16xf32>,
    return
  }
  func.func @transform_0(%arg0: i32, %arg1: i32) -> (i32, i32, i32, i32) {
    %c0_i32 = arith.constant 0 : i32
    %c0_i32_0 = arith.constant 0 : i32
    %c0_i32_1 = arith.constant 0 : i32
    return %arg0, %arg1, %c0_i32, %c0_i32_0 : i32, i32, i32, i32
  }
  func.func @transform_1(%arg0: i32, %arg1: i32) -> (i32, i32) {
    %c0_i32 = arith.constant 0 : i32
    %c0_i32_0 = arith.constant 0 : i32
    %c0_i32_1 = arith.constant 0 : i32
    return %c0_i32, %c0_i32_0 : i32, i32
  }
  func.func @transform_2(%arg0: i32, %arg1: i32) -> (i32, i32) {
    %c0_i32 = arith.constant 0 : i32
    %c0_i32_0 = arith.constant 0 : i32
    %c0_i32_1 = arith.constant 0 : i32
    return %c0_i32, %c0_i32_0 : i32, i32
  }
  func.func @transform_3(%arg0: i32, %arg1: i32) -> (i32, i32, i32) {
    %c0_i32 = arith.constant 0 : i32
    %c0_i32_0 = arith.constant 0 : i32
    %c0_i32_1 = arith.constant 0 : i32
    %c0_i32_2 = arith.constant 0 : i32
    return %c0_i32, %c0_i32_0, %c0_i32_1 : i32, i32, i32
  }
  func.func @transform_4(%arg0: i32, %arg1: i32) -> (i32, i32) {
    %c0_i32 = arith.constant 0 : i32
    %c0_i32_0 = arith.constant 0 : i32
    %c0_i32_1 = arith.constant 0 : i32
    return %c0_i32, %c0_i32_0 : i32, i32
  }
  func.func @transform_5(%arg0: i32, %arg1: i32) -> (i32, i32, i32) {
    %c0_i32 = arith.constant 0 : i32
    %c0_i32_0 = arith.constant 0 : i32
    %c0_i32_1 = arith.constant 0 : i32
    %c0_i32_2 = arith.constant 0 : i32
    return %c0_i32, %c0_i32_0, %c0_i32_1 : i32, i32, i32
  }
  func.func @transform_6(%arg0: i32, %arg1: i32) -> (i32, i32) {
    %c0_i32 = arith.constant 0 : i32
    %c0_i32_0 = arith.constant 0 : i32
    %c0_i32_1 = arith.constant 0 : i32
    return %c0_i32, %c0_i32_0 : i32, i32
  }
  func.func @transform_7(%arg0: i32, %arg1: i32) -> (i32, i32, i32) {
    %c0_i32 = arith.constant 0 : i32
    %c0_i32_0 = arith.constant 0 : i32
    return %arg0, %c0_i32, %arg1 : i32, i32, i32
  }
}

</mosaic_0001>

<bundles_post_ra>
// kernel: fcn_feature_extractor.1
= control target key start
LH: loop header
LB: loop body
LE: loop exit
PB: predicated region body
PF: predicated region fallthrough
CT: control target
= control target key end

     0   :  { %s2210_s24 = smov 0   ;;  %s2212_s25 = smov 0   ;;  %s3141_s0 = inlined_call_operand.vmem [shape: f32[2,1,22,32], index: 0, kind: input, shape index: {}]   ;;  %s3142_s1 = inlined_call_operand.vmem [shape: f32[32,128], index: 1, kind: input, shape index: {}]   ;;  %s3143_s2 = inlined_call_operand.vmem [shape: f32[1,128], index: 2, kind: input, shape index: {}]   ;;  %s3144_s3 = inlined_call_operand.vmem [shape: f32[5,128,256], index: 3, kind: input, shape index: {}]   ;;  %s3145_s4 = inlined_call_operand.vmem [shape: f32[1,256], index: 4, kind: input, shape index: {}]   ;;  %s3146_s5 = inlined_call_operand.vmem [shape: f32[3,256,128], index: 5, kind: input, shape index: {}]   ;;  %s3147_s6 = inlined_call_operand.vmem [shape: f32[1,128], index: 6, kind: input, shape index: {}]   ;;  %s3148_s7 = inlined_call_operand.vmem [shape: f32[2,128,16], index: 7, kind: output, shape index: {}]  }
   0x1   :  { %s2214_s26 = smov 0  }
   0x2 LB: > { %s29_s27 = sadd.s32 1, %s2162_s25  ;;  %p1769_p0 = scmp.ge.s32.totalorder %s2166_s26, 1  ;;  %s2166_s26 = sphi %s2214_s26, %s17_s26   ;;  %s2162_s25 = sphi %s2212_s25, %s3150_s25   ;;  %s2158_s24 = sphi %s2210_s24, %s3149_s24  }
   0x3   : > { %p31_p1 = scmp.ge.s32.totalorder %s29_s27, 2  ;;  %p257_p2 = scmp.lt.s32.totalorder %s2166_s26, 3 }
   0x5   : > { %s3152_s27 = smov (%p31_p1, %s29_s27), 0  ;;  %p258_p3 = pnand %p1769_p0, %p257_p2 }
   0x6   : > { %p296_p4 = scmp.lt.s32.totalorder (!%p258_p3), %s2158_s24, 1 }
   0x7   : > { %261 = sbr.rel (%p258_p3) target bundleno = 946 (0x3b2), region = 48 }
   0xc   : > { %v320_v0 = vld [vmem:[%s3142_s1 + $0x18] sm:$0xff]  ;;  %v2168_v1 = vmov 0.0   ;;  %v319_v2 = vld [vmem:[%s3142_s1 + $0x10] sm:$0xff]  ;;  %vm2169_vm0 = vmmov 0   ;;  %s3154_s24 = smov (!%p296_p4, %s2158_s24), 1  ;;  %v318_v4 = vld [vmem:[%s3142_s1 + $0x8] sm:$0xff] }
   0xd   : > { %2100 = vmatprep.subr.mxu0 %v2168_v1  ;;  %2108 = vmatprep.mubr.msk.f32.mxu0 %vm2169_vm0, %v2168_v1  ;;  %v1812_v3 = vld [vmem:[%s3144_s3 + $0x1f8] sm:$0xff]  ;;  %v1811_v5 = vld [vmem:[%s3144_s3 + $0x1f0] sm:$0xff]  ;;  %v1810_v6 = vld [vmem:[%s3144_s3 + $0x1e8] sm:$0xff]  ;;  %s2117_s17 = smul.u32 24, %s3154_s24  ;;  %vm328_vm1 = vcmask 261120   ;;  %vm1313_vm6 = vcmask 1046528  }
   0xe   : > { %2101 = vmatpush3.msra.mxu0 %v320_v0  ;;  %623 = vmatprep.mubr.f32.mxu1 %v2168_v1  ;;  %v1809_v7 = vld [vmem:[%s3144_s3 + $0x1e0] sm:$0xff]  ;;  %v1808_v9 = vld [vmem:[%s3144_s3 + $0x1d8] sm:$0xff]  ;;  %v1807_v10 = vld [vmem:[%s3144_s3 + $0x1d0] sm:$0xff]  ;;  %vm1519_vm7 = vcmask 1045504   ;;  %s1978_s22 = sshll.u32 %s3154_s24, 7  ;;  %vm1654_vm8 = vcmask 130048  }
   0xf   : > { %2102 = vmatprep.subr.mxu0 %v2168_v1  ;;  %559 = vmatprep.subr.mxu1 %v1812_v3  ;;  %v317_v8 = vld [vmem:[%s3142_s1] sm:$0xff]  ;;  %s304_s9 = scalar_lea.vmem %s3141_s0, %s2117_s17  ;;  %v522_v11 = vld [vmem:[%s3144_s3 + $0xf8] sm:$0xff]  ;;  %v521_v13 = vld [vmem:[%s3144_s3 + $0xf0] sm:$0xff]  ;;  %s3098_s29 = scalar_lea.vmem %s3148_s7, %s1978_s22 }
  0x10   : > { %2103 = vmatpush3.msra.mxu0 %v319_v2  ;;  %560 = vmatpush1.msra.mxu1 %v1811_v5  ;;  %v314_v12 = vld [vmem:[%s304_s9] sm:$0xff]  ;;  %v520_v14 = vld [vmem:[%s3144_s3 + $0xe8] sm:$0xff]  ;;  %v518_v19 = vld [vmem:[%s3144_s3 + $0xd8] sm:$0xff] }
  0x11   : > { %2104 = vmatprep.subr.mxu0 %v2168_v1  ;;  %561 = vmatprep.subr.mxu1 %v1810_v6  ;;  %v1806_v15 = vld [vmem:[%s3144_s3 + $0x1c8] sm:$0xff]  ;;  %v519_v16 = vld [vmem:[%s3144_s3 + $0xe0] sm:$0xff]  ;;  %v517_v20 = vld [vmem:[%s3144_s3 + $0xd0] sm:$0xff] }
  0x12   : > { %2105 = vmatpush3.msra.mxu0 %v318_v4  ;;  %562 = vmatpush1.msra.mxu1 %v1809_v7  ;;  %v1805_v17 = vld [vmem:[%s3144_s3 + $0x1c0] sm:$0xff]  ;;  %v315_v18 = vld [vmem:[%s304_s9 + $0x8] sm:$0xff]  ;;  %v316_v23 = vld [vmem:[%s304_s9 + $0x10] sm:$0x3f] }
  0x13   : > { %2106 = vmatprep.subr.mxu0 %v2168_v1  ;;  %563 = vmatprep.subr.mxu1 %v1808_v9  ;;  %v516_v21 = vld [vmem:[%s3144_s3 + $0xc8] sm:$0xff]  ;;  %v515_v22 = vld [vmem:[%s3144_s3 + $0xc0] sm:$0xff]  ;;  %v514_v24 = vld [vmem:[%s3144_s3 + $0xb8] sm:$0xff] }
  0x14   : > { %2107 = vmatpush3.msra.mxu0 %v317_v8  ;;  %564 = vmatpush1.msra.mxu1 %v1807_v10  ;;  %v513_v25 = vld [vmem:[%s3144_s3 + $0xb0] sm:$0xff]  ;;  %v512_v26 = vld [vmem:[%s3144_s3 + $0xa8] sm:$0xff]  ;;  %v511_v27 = vld [vmem:[%s3144_s3 + $0xa0] sm:$0xff] }
  0x15   : > { %2109 = vmatmul.mubr.msk.f32.vlgmr.msra.gmra.mxu0 %vm328_vm1, %v314_v12  ;;  %642 = vmatprep.subr.mxu0 %v522_v11  ;;  %v510_v28 = vld [vmem:[%s3144_s3 + $0x98] sm:$0xff]  ;;  %v509_v29 = vld [vmem:[%s3144_s3 + $0x90] sm:$0xff]  ;;  %v508_v30 = vld [vmem:[%s3144_s3 + $0x88] sm:$0xff] }
  0x16   : > { %2111 = vmatprep.mubr.msk.f32.mxu0 %vm2169_vm0, %v2168_v1  ;;  %643 = vmatpush1.msra.mxu0 %v521_v13  ;;  %v507_v31 = vld [vmem:[%s3144_s3 + $0x80] sm:$0xff]  ;;  %v1804_v32 = vld [vmem:[%s3144_s3 + $0x1b8] sm:$0xff]  ;;  %v1803_v34 = vld [vmem:[%s3144_s3 + $0x1b0] sm:$0xff] }
  0x17   : > { %644 = vmatprep.subr.mxu0 %v520_v14  ;;  %565 = vmatprep.subr.mxu1 %v1806_v15  ;;  %v506_v33 = vld [vmem:[%s3144_s3 + $0x78] sm:$0xff]  ;;  %v505_v35 = vld [vmem:[%s3144_s3 + $0x70] sm:$0xff]  ;;  %v1802_v36 = vld [vmem:[%s3144_s3 + $0x1a8] sm:$0xff]  ;;  %v440_v14 = vlaneseq }
  0x18   : > { %645 = vmatpush1.msra.mxu0 %v519_v16  ;;  %566 = vmatpush1.msra.mxu1 %v1805_v17  ;;  %v504_v37 = vld [vmem:[%s3144_s3 + $0x68] sm:$0xff]  ;;  %v1801_v38 = vld [vmem:[%s3144_s3 + $0x1a0] sm:$0xff]  ;;  %v1800_v40 = vld [vmem:[%s3144_s3 + $0x198] sm:$0xff] }
  0x19   : > { %2112 = vmatmul.mubr.msk.f32.gmra.mxu0 %vm328_vm1, %v315_v18  ;;  %646 = vmatprep.subr.mxu0 %v518_v19  ;;  %v503_v39 = vld [vmem:[%s3144_s3 + $0x60] sm:$0xff]  ;;  %v502_v41 = vld [vmem:[%s3144_s3 + $0x58] sm:$0xff]  ;;  %v1799_v42 = vld [vmem:[%s3144_s3 + $0x190] sm:$0xff]  ;;  %v2462_v19 = vshrl.u32 %v440_v14, 7 }
  0x1a   : > { %2114 = vmatprep.mubr.msk.f32.mxu0 %vm2169_vm0, %v2168_v1  ;;  %647 = vmatpush1.msra.mxu0 %v517_v20  ;;  %v501_v43 = vld [vmem:[%s3144_s3 + $0x50] sm:$0xff]  ;;  %v1798_v44 = vld [vmem:[%s3144_s3 + $0x188] sm:$0xff]  ;;  %v1797_v46 = vld [vmem:[%s3144_s3 + $0x180] sm:$0xff] }
  0x1b   : > { %648 = vmatprep.subr.mxu0 %v516_v21  ;;  %567 = vmatprep.subr.mxu1 %v1804_v32  ;;  %v500_v45 = vld [vmem:[%s3144_s3 + $0x48] sm:$0xff]  ;;  %v499_v47 = vld [vmem:[%s3144_s3 + $0x40] sm:$0xff]  ;;  %v1796_v48 = vld [vmem:[%s3144_s3 + $0x178] sm:$0xff]  ;;  %vm449_vm2 = vcmp.lt.s32.totalorder %v2462_v19, 3  ;;  %vm1169_vm4 = vcmp.lt.s32.totalorder %v2462_v19, 1 }
  0x1c   : > { %649 = vmatpush1.msra.mxu0 %v515_v22  ;;  %568 = vmatpush1.msra.mxu1 %v1803_v34  ;;  %v498_v49 = vld [vmem:[%s3144_s3 + $0x38] sm:$0xff]  ;;  %v1795_v50 = vld [vmem:[%s3144_s3 + $0x170] sm:$0xff]  ;;  %v1794_v52 = vld [vmem:[%s3144_s3 + $0x168] sm:$0xff] }
  0x1d   : > { %2115 = vmatmul.mubr.msk.f32.gmra.mxu0 %vm328_vm1, %v316_v23  ;;  %650 = vmatprep.subr.mxu0 %v514_v24  ;;  %v497_v51 = vld [vmem:[%s3144_s3 + $0x30] sm:$0xff]  ;;  %v496_v53 = vld [vmem:[%s3144_s3 + $0x28] sm:$0xff]  ;;  %v1793_v54 = vld [vmem:[%s3144_s3 + $0x160] sm:$0xff] }
  0x1e   : > { %651 = vmatpush1.msra.mxu0 %v513_v25  ;;  %706 = vmatprep.mubr.f32.mxu0 %v2168_v1  ;;  %v495_v55 = vld [vmem:[%s3144_s3 + $0x20] sm:$0xff]  ;;  %v1792_v56 = vld [vmem:[%s3144_s3 + $0x158] sm:$0xff]  ;;  %v1791_v58 = vld [vmem:[%s3144_s3 + $0x150] sm:$0xff] }
  0x1f   : > { %652 = vmatprep.subr.mxu0 %v512_v26  ;;  %569 = vmatprep.subr.mxu1 %v1802_v36  ;;  %v494_v57 = vld [vmem:[%s3144_s3 + $0x18] sm:$0xff]  ;;  %v493_v59 = vld [vmem:[%s3144_s3 + $0x10] sm:$0xff]  ;;  %v1790_v60 = vld [vmem:[%s3144_s3 + $0x148] sm:$0xff] }
  0x20   : > { %653 = vmatpush1.msra.mxu0 %v511_v27  ;;  %570 = vmatpush1.msra.mxu1 %v1801_v38  ;;  %v492_v61 = vld [vmem:[%s3144_s3 + $0x8] sm:$0xff]  ;;  %v1789_v62 = vld [vmem:[%s3144_s3 + $0x140] sm:$0xff]  ;;  %v1788_v0 = vld [vmem:[%s3144_s3 + $0x138] sm:$0xff] }
  0x21   : > { %654 = vmatprep.subr.mxu0 %v510_v28  ;;  %571 = vmatprep.subr.mxu1 %v1800_v40  ;;  %v491_v63 = vld [vmem:[%s3144_s3] sm:$0xff]  ;;  %v1876_v2 = vld [vmem:[%s3144_s3 + $0x3f8] sm:$0xff]  ;;  %v1787_v3 = vld [vmem:[%s3144_s3 + $0x130] sm:$0xff] }
  0x22   : > { %655 = vmatpush1.msra.mxu0 %v509_v29  ;;  %572 = vmatpush1.msra.mxu1 %v1799_v42  ;;  %v1786_v4 = vld [vmem:[%s3144_s3 + $0x128] sm:$0xff]  ;;  %v1785_v5 = vld [vmem:[%s3144_s3 + $0x120] sm:$0xff]  ;;  %v1784_v6 = vld [vmem:[%s3144_s3 + $0x118] sm:$0xff] }
  0x23   : > { %656 = vmatprep.subr.mxu0 %v508_v30  ;;  %573 = vmatprep.subr.mxu1 %v1798_v44  ;;  %v1783_v7 = vld [vmem:[%s3144_s3 + $0x110] sm:$0xff]  ;;  %v1782_v8 = vld [vmem:[%s3144_s3 + $0x108] sm:$0xff]  ;;  %v1781_v9 = vld [vmem:[%s3144_s3 + $0x100] sm:$0xff]  ;;  %v2472_v30 = vadd.s32 16, %v2462_v19 }
  0x24   : > { %657 = vmatpush1.msra.mxu0 %v507_v31  ;;  %574 = vmatpush1.msra.mxu1 %v1797_v46  ;;  %v1844_v10 = vld [vmem:[%s3144_s3 + $0x2f8] sm:$0xff]  ;;  %v1773_v11 = vld [vmem:[%s3143_s2] ss:$0 sm:$0xff]  ;;  %v1875_v27 = vld [vmem:[%s3144_s3 + $0x3f0] sm:$0xff] }
  0x25   : > { %658 = vmatprep.subr.mxu0 %v506_v33  ;;  %575 = vmatprep.subr.mxu1 %v1796_v48  ;;  %v1874_v29 = vld [vmem:[%s3144_s3 + $0x3e8] sm:$0xff]  ;;  %v1873_v31 = vld [vmem:[%s3144_s3 + $0x3e0] sm:$0xff]  ;;  %v1872_v32 = vld [vmem:[%s3144_s3 + $0x3d8] sm:$0xff]  ;;  %vm455_vm3 = vcmp.gt.s32.totalorder %v2472_v30, 18  ;;  %vm1175_vm5 = vcmp.gt.s32.totalorder %v2472_v30, 16 }
  0x26   : > { %659 = vmatpush1.msra.mxu0 %v505_v35  ;;  %576 = vmatpush1.msra.mxu1 %v1795_v50  ;;  %v1871_v33 = vld [vmem:[%s3144_s3 + $0x3d0] sm:$0xff]  ;;  %v1870_v34 = vld [vmem:[%s3144_s3 + $0x3c8] sm:$0xff]  ;;  %v1869_v35 = vld [vmem:[%s3144_s3 + $0x3c0] sm:$0xff] }
  0x27   : > { %660 = vmatprep.subr.mxu0 %v504_v37  ;;  %577 = vmatprep.subr.mxu1 %v1794_v52  ;;  %v1868_v36 = vld [vmem:[%s3144_s3 + $0x3b8] sm:$0xff]  ;;  %v1842_v42 = vld [vmem:[%s3144_s3 + $0x2e8] sm:$0xff]  ;;  %v1841_v44 = vld [vmem:[%s3144_s3 + $0x2e0] sm:$0xff] }
  0x28   : > { %661 = vmatpush1.msra.mxu0 %v503_v39  ;;  %578 = vmatpush1.msra.mxu1 %v1793_v54  ;;  %v1843_v39 = vld [vmem:[%s3144_s3 + $0x2f0] sm:$0xff]  ;;  %v1840_v46 = vld [vmem:[%s3144_s3 + $0x2d8] sm:$0xff]  ;;  %v1838_v50 = vld [vmem:[%s3144_s3 + $0x2c8] sm:$0xff] }
  0x29   : > { %662 = vmatprep.subr.mxu0 %v502_v41  ;;  %579 = vmatprep.subr.mxu1 %v1792_v56  ;;  %v1839_v48 = vld [vmem:[%s3144_s3 + $0x2d0] sm:$0xff]  ;;  %v1837_v52 = vld [vmem:[%s3144_s3 + $0x2c0] sm:$0xff]  ;;  %v1836_v54 = vld [vmem:[%s3144_s3 + $0x2b8] sm:$0xff] }
  0x2a   : > { %663 = vmatpush1.msra.mxu0 %v501_v43  ;;  %580 = vmatpush1.msra.mxu1 %v1791_v58  ;;  %v1867_v43 = vld [vmem:[%s3144_s3 + $0x3b0] sm:$0xff]  ;;  %v1861_v56 = vld [vmem:[%s3144_s3 + $0x380] sm:$0xff]  ;;  %v1834_v58 = vld [vmem:[%s3144_s3 + $0x2a8] sm:$0xff] }
  0x2b   : > { %664 = vmatprep.subr.mxu0 %v500_v45  ;;  %581 = vmatprep.subr.mxu1 %v1790_v60  ;;  %v1866_v45 = vld [vmem:[%s3144_s3 + $0x3a8] sm:$0xff]  ;;  %v1833_v60 = vld [vmem:[%s3144_s3 + $0x2a0] sm:$0xff]  ;;  %v1824_v14 = vld [vmem:[%s3144_s3 + $0x258] sm:$0xff] }
  0x2c   : > { %665 = vmatpush1.msra.mxu0 %v499_v47  ;;  %582 = vmatpush1.msra.mxu1 %v1789_v62  ;;  %v1865_v47 = vld [vmem:[%s3144_s3 + $0x3a0] sm:$0xff]  ;;  %v1832_v62 = vld [vmem:[%s3144_s3 + $0x298] sm:$0xff] }
  0x2d   : > { %666 = vmatprep.subr.mxu0 %v498_v49  ;;  %583 = vmatprep.subr.mxu1 %v1788_v0  ;;  %v1864_v49 = vld [vmem:[%s3144_s3 + $0x398] sm:$0xff]  ;;  %v1831_v0 = vld [vmem:[%s3144_s3 + $0x290] sm:$0xff] }
  0x2e   : > { %667 = vmatpush1.msra.mxu0 %v497_v51  ;;  %584 = vmatpush1.msra.mxu1 %v1787_v3  ;;  %v1863_v51 = vld [vmem:[%s3144_s3 + $0x390] sm:$0xff]  ;;  %v1830_v3 = vld [vmem:[%s3144_s3 + $0x288] sm:$0xff] }
  0x2f   : > { %668 = vmatprep.subr.mxu0 %v496_v53  ;;  %585 = vmatprep.subr.mxu1 %v1786_v4  ;;  %v1862_v53 = vld [vmem:[%s3144_s3 + $0x388] sm:$0xff]  ;;  %v1856_v4 = vld [vmem:[%s3144_s3 + $0x358] sm:$0xff] }
  0x30   : > { %669 = vmatpush1.msra.mxu0 %v495_v55  ;;  %586 = vmatpush1.msra.mxu1 %v1785_v5  ;;  %v1835_v55 = vld [vmem:[%s3144_s3 + $0x2b0] sm:$0xff]  ;;  %v1829_v5 = vld [vmem:[%s3144_s3 + $0x280] sm:$0xff] }
  0x31   : > { %670 = vmatprep.subr.mxu0 %v494_v57  ;;  %587 = vmatprep.subr.mxu1 %v1784_v6  ;;  %v1855_v6 = vld [vmem:[%s3144_s3 + $0x350] sm:$0xff] }
  0x32   : > { %671 = vmatpush1.msra.mxu0 %v493_v59  ;;  %588 = vmatpush1.msra.mxu1 %v1783_v7  ;;  %v1860_v59 = vld [vmem:[%s3144_s3 + $0x378] sm:$0xff] }
  0x33   : > { %672 = vmatprep.subr.mxu0 %v492_v61  ;;  %589 = vmatprep.subr.mxu1 %v1782_v8  ;;  %v1859_v61 = vld [vmem:[%s3144_s3 + $0x370] sm:$0xff]  ;;  %v1828_v7 = vld [vmem:[%s3144_s3 + $0x278] sm:$0xff]  ;;  %v1854_v8 = vld [vmem:[%s3144_s3 + $0x348] sm:$0xff] }
  0x34   : > { %673 = vmatpush1.msra.mxu0 %v491_v63  ;;  %590 = vmatpush1.msra.mxu1 %v1781_v9  ;;  %v1858_v63 = vld [vmem:[%s3144_s3 + $0x368] sm:$0xff]  ;;  %v1827_v9 = vld [vmem:[%s3144_s3 + $0x270] sm:$0xff] }
  0x35   : > { %886 = vmatprep.subr.mxu0 %v1876_v2  ;;  %761 = vmatprep.subr.mxu1 %v1844_v10  ;;  %v1857_v2 = vld [vmem:[%s3144_s3 + $0x360] sm:$0xff] }
  0x36   : > { %v1853_v10 = vld [vmem:[%s3144_s3 + $0x340] sm:$0xff] }
  0xd5   : > { %v404_v12 = vpop.f32.mrf.mxu0 }
  0xd6   : > { %v405_v13 = vadd.f32 %v1773_v11, %v404_v12  ;;  %v1852_v12 = vld [vmem:[%s3144_s3 + $0x338] sm:$0xff] }
  0xd7   : > { %v2110_v15 = vpop.f32.mrf.mxu0 }
  0xd8   : > { %v418_v16 = vmax.f32 %v405_v13, 0.0  ;;  %v1825_v13 = vld [vmem:[%s3144_s3 + $0x260] sm:$0xff]  ;;  %v1851_v15 = vld [vmem:[%s3144_s3 + $0x330] sm:$0xff] }
  0xd9   : > { %v409_v17 = vpop.f32.mrf.mxu0 }
  0xda   : > { %421 = vst [vmem:[#allocation2] sm:$0xff] %v418_v16  ;;  %v410_v18 = vadd.f32 %v1773_v11, %v409_v17 }
  0xdb   : > { %v2113_v20 = vpop.f32.mrf.mxu0 }
  0xdc   : > { %v419_v21 = vmax.f32 %v410_v18, 0.0  ;;  %v1822_v18 = vld [vmem:[%s3144_s3 + $0x248] sm:$0xff] }
  0xdd   : > { %v414_v22 = vpop.f32.mrf.mxu0 }
  0xde   : > { %486 = vst [vmem:[#allocation2 + $0x8] sm:$0xff] %v419_v21  ;;  %v415_v23 = vadd.f32 %v1773_v11, %v414_v22  ;;  %v1826_v11 = vld [vmem:[%s3144_s3 + $0x268] sm:$0xff] }
  0xdf   : > { %v2116_v24 = vpop.f32.mrf.mxu0  ;;  %v1850_v22 = vld [vmem:[%s3144_s3 + $0x328] sm:$0xff] }
  0xe0   : > { %v420_v25 = vmax.f32 %v415_v23, 0.0  ;;  %v1820_v23 = vld [vmem:[%s3144_s3 + $0x238] sm:$0xff]  ;;  %v1849_v24 = vld [vmem:[%s3144_s3 + $0x320] sm:$0xff] }
  0xe1   : > { %v1780_v26 = vld [vmem:[#allocation2 + $0x3] ss:$0 sm:$0xff] }
  0xe2   : > { %v482_v28 = vsel %vm449_vm2, %v1780_v26, %v418_v16  ;;  %423 = vst [vmem:[#allocation2 + $0x10] sm:$0x3f] %v420_v25  ;;  %v1823_v16 = vld [vmem:[%s3144_s3 + $0x250] sm:$0xff]  ;;  %v1848_v26 = vld [vmem:[%s3144_s3 + $0x318] sm:$0xff] }
  0xe3   : > { %485 = vst [vmem:[#allocation2] sm:$0xff] %v482_v28  ;;  %707 = vmatmul.mubr.f32.vlgmr.msra.gmra.mxu0 %v482_v28  ;;  %v1819_v25 = vld [vmem:[%s3144_s3 + $0x230] sm:$0xff] }
  0xe4   : > { %887 = vmatpush1.msra.mxu0 %v1875_v27  ;;  %712 = vmatprep.mubr.f32.mxu0 %v2168_v1  ;;  %v1818_v27 = vld [vmem:[%s3144_s3 + $0x228] sm:$0xff]  ;;  %v1847_v28 = vld [vmem:[%s3144_s3 + $0x310] sm:$0xff] }
  0xe5   : > { %888 = vmatprep.subr.mxu0 %v1874_v29  ;;  %v1817_v29 = vld [vmem:[%s3144_s3 + $0x220] sm:$0xff] }
  0xe6   : > { %889 = vmatpush1.msra.mxu0 %v1873_v31  ;;  %v1846_v31 = vld [vmem:[%s3144_s3 + $0x308] sm:$0xff] }
  0xe7   : > { %890 = vmatprep.subr.mxu0 %v1872_v32  ;;  %713 = vmatmul.mubr.f32.gmra.mxu0 %v419_v21  ;;  %v1821_v21 = vld [vmem:[%s3144_s3 + $0x240] sm:$0xff]  ;;  %v1816_v32 = vld [vmem:[%s3144_s3 + $0x218] sm:$0xff] }
  0xe8   : > { %891 = vmatpush1.msra.mxu0 %v1871_v33  ;;  %718 = vmatprep.mubr.f32.mxu0 %v2168_v1  ;;  %v1845_v33 = vld [vmem:[%s3144_s3 + $0x300] sm:$0xff] }
  0xe9   : > { %v1779_v37 = vld [vmem:[#allocation2 + $0x12] ss:$0 sm:$0xff]  ;;  %892 = vmatprep.subr.mxu0 %v1870_v34 }
  0xea   : > { %v458_v38 = vld [vmem:[#allocation2 + $0x10] sm:$0x3f]  ;;  %v523_v41 = vld [vmem:[#allocation2 + $0x1] sm:$0xff]  ;;  %893 = vmatpush1.msra.mxu0 %v1869_v35 }
  0xeb   : > { %v471_v40 = vsel %vm455_vm3, %v1779_v37, %v458_v38  ;;  %624 = vmatmul.mubr.f32.vlgmr.msra.gmra.mxu1 %v523_v41  ;;  %894 = vmatprep.subr.mxu0 %v1868_v36  ;;  %v1815_v34 = vld [vmem:[%s3144_s3 + $0x210] sm:$0xff]  ;;  %v1814_v35 = vld [vmem:[%s3144_s3 + $0x208] sm:$0xff]  ;;  %v1813_v36 = vld [vmem:[%s3144_s3 + $0x200] sm:$0xff] }
  0xec   : > { %487 = vst [vmem:[#allocation2 + $0x10] sm:$0x3f] %v471_v40  ;;  %762 = vmatpush1.msra.mxu1 %v1843_v39  ;;  %629 = vmatprep.mubr.f32.mxu1 %v2168_v1  ;;  %v850_v37 = vld [vmem:[#allocation2 + $0x3] sm:$0xff]  ;;  %v1908_v38 = vld [vmem:[%s3144_s3 + $0x4f8] sm:$0xff]  ;;  %v1907_v40 = vld [vmem:[%s3144_s3 + $0x4f0] sm:$0xff] }
  0xed   : > { %763 = vmatprep.subr.mxu1 %v1842_v42  ;;  %895 = vmatpush1.msra.mxu0 %v1867_v43  ;;  %v725_v39 = vld [vmem:[#allocation2 + $0x2] sm:$0xff] }
  0xee   : > { %764 = vmatpush1.msra.mxu1 %v1841_v44  ;;  %896 = vmatprep.subr.mxu0 %v1866_v45  ;;  %v1906_v41 = vld [vmem:[%s3144_s3 + $0x4e8] sm:$0xff]  ;;  %v1905_v43 = vld [vmem:[%s3144_s3 + $0x4e0] sm:$0xff]  ;;  %v1904_v44 = vld [vmem:[%s3144_s3 + $0x4d8] sm:$0xff] }
  0xef   : > { %765 = vmatprep.subr.mxu1 %v1840_v46  ;;  %897 = vmatpush1.msra.mxu0 %v1865_v47  ;;  %v1903_v45 = vld [vmem:[%s3144_s3 + $0x4d0] sm:$0xff]  ;;  %v1902_v47 = vld [vmem:[%s3144_s3 + $0x4c8] sm:$0xff] }
  0xf0   : > { %766 = vmatpush1.msra.mxu1 %v1839_v48  ;;  %898 = vmatprep.subr.mxu0 %v1864_v49  ;;  %v1901_v49 = vld [vmem:[%s3144_s3 + $0x4c0] sm:$0xff] }
  0xf1   : > { %767 = vmatprep.subr.mxu1 %v1838_v50  ;;  %899 = vmatpush1.msra.mxu0 %v1863_v51  ;;  %v1900_v50 = vld [vmem:[%s3144_s3 + $0x4b8] sm:$0xff]  ;;  %v1899_v51 = vld [vmem:[%s3144_s3 + $0x4b0] sm:$0xff] }
  0xf2   : > { %768 = vmatpush1.msra.mxu1 %v1837_v52  ;;  %900 = vmatprep.subr.mxu0 %v1862_v53  ;;  %v1898_v53 = vld [vmem:[%s3144_s3 + $0x4a8] sm:$0xff] }
  0xf3   : > { %v524_v57 = vld [vmem:[#allocation2 + $0x9] sm:$0xff]  ;;  %769 = vmatprep.subr.mxu1 %v1836_v54  ;;  %901 = vmatpush1.msra.mxu0 %v1861_v56  ;;  %v525_v20 = vld [vmem:[#allocation2 + $0x11] sm:$0x3]  ;;  %v852_v48 = vld [vmem:[#allocation2 + $0x13] sm:$0x3] }
  0xf4   : > { %630 = vmatmul.mubr.f32.gmra.mxu1 %v524_v57  ;;  %902 = vmatprep.subr.mxu0 %v1860_v59  ;;  %v490_v17 = vld [vmem:[#allocation2 + $0x10] sm:$0x3]  ;;  %v727_v52 = vld [vmem:[#allocation2 + $0x12] sm:$0x3]  ;;  %v1897_v54 = vld [vmem:[%s3144_s3 + $0x4a0] sm:$0xff] }
  0xf5   : > { %770 = vmatpush1.msra.mxu1 %v1835_v55  ;;  %903 = vmatpush1.msra.mxu0 %v1859_v61  ;;  %v851_v42 = vld [vmem:[#allocation2 + $0xb] sm:$0xff]  ;;  %v1896_v55 = vld [vmem:[%s3144_s3 + $0x498] sm:$0xff] }
  0xf6   : > { %771 = vmatprep.subr.mxu1 %v1834_v58  ;;  %904 = vmatprep.subr.mxu0 %v1858_v63  ;;  %v726_v46 = vld [vmem:[#allocation2 + $0xa] sm:$0xff]  ;;  %v1893_v58 = vld [vmem:[%s3144_s3 + $0x480] sm:$0xff]  ;;  %v1892_v59 = vld [vmem:[%s3144_s3 + $0x478] sm:$0xff] }
  0xf7   : > { %772 = vmatpush1.msra.mxu1 %v1833_v60  ;;  %905 = vmatpush1.msra.mxu0 %v1857_v2  ;;  %v1895_v56 = vld [vmem:[%s3144_s3 + $0x490] sm:$0xff]  ;;  %v1894_v57 = vld [vmem:[%s3144_s3 + $0x488] sm:$0xff]  ;;  %v1888_v63 = vld [vmem:[%s3144_s3 + $0x458] sm:$0xff] }
  0xf8   : > { %773 = vmatprep.subr.mxu1 %v1832_v62  ;;  %906 = vmatprep.subr.mxu0 %v1856_v4  ;;  %v1891_v60 = vld [vmem:[%s3144_s3 + $0x470] sm:$0xff]  ;;  %v1890_v61 = vld [vmem:[%s3144_s3 + $0x468] sm:$0xff]  ;;  %v1889_v62 = vld [vmem:[%s3144_s3 + $0x460] sm:$0xff] }
  0xf9   : > { %774 = vmatpush1.msra.mxu1 %v1831_v0  ;;  %907 = vmatpush1.msra.mxu0 %v1855_v6  ;;  %v1887_v0 = vld [vmem:[%s3144_s3 + $0x450] sm:$0xff]  ;;  %v1886_v2 = vld [vmem:[%s3144_s3 + $0x448] sm:$0xff]  ;;  %v1884_v4 = vld [vmem:[%s3144_s3 + $0x438] sm:$0xff] }
  0xfa   : > { %775 = vmatprep.subr.mxu1 %v1830_v3  ;;  %908 = vmatprep.subr.mxu0 %v1854_v8  ;;  %v1885_v3 = vld [vmem:[%s3144_s3 + $0x440] sm:$0xff]  ;;  %v1882_v6 = vld [vmem:[%s3144_s3 + $0x428] sm:$0xff]  ;;  %v1880_v8 = vld [vmem:[%s3144_s3 + $0x418] sm:$0xff] }
  0xfb   : > { %776 = vmatpush1.msra.mxu1 %v1829_v5  ;;  %909 = vmatpush1.msra.mxu0 %v1853_v10  ;;  %v1883_v5 = vld [vmem:[%s3144_s3 + $0x430] sm:$0xff]  ;;  %v1878_v10 = vld [vmem:[%s3144_s3 + $0x408] sm:$0xff] }
  0xfc   : > { %777 = vmatprep.subr.mxu1 %v1828_v7  ;;  %910 = vmatprep.subr.mxu0 %v1852_v12  ;;  %v1881_v7 = vld [vmem:[%s3144_s3 + $0x420] sm:$0xff] }
  0xfd   : > { %778 = vmatpush1.msra.mxu1 %v1827_v9  ;;  %635 = vmatprep.mubr.f32.mxu1 %v2168_v1  ;;  %v1879_v9 = vld [vmem:[%s3144_s3 + $0x410] sm:$0xff]  ;;  %v975_v12 = vld [vmem:[#allocation2 + $0x4] sm:$0xff] }
  0xfe   : > { %779 = vmatprep.subr.mxu1 %v1826_v11  ;;  %911 = vmatpush1.msra.mxu0 %v1851_v15  ;;  %v1877_v11 = vld [vmem:[%s3144_s3 + $0x400] sm:$0xff]  ;;  %v1269_v15 = vld [vmem:[%s3146_s5 + $0xf8] sm:$0xff] }
  0xff   : > { %780 = vmatpush1.msra.mxu1 %v1825_v13  ;;  %719 = vmatmul.mubr.f32.gmra.mxu0 %v490_v17  ;;  %v976_v13 = vld [vmem:[#allocation2 + $0xc] sm:$0xff] }
 0x100   : > { %781 = vmatprep.subr.mxu1 %v1824_v14  ;;  %636 = vmatmul.mubr.f32.gmra.mxu1 %v525_v20  ;;  %v977_v14 = vld [vmem:[#allocation2 + $0x14] sm:$0x3]  ;;  %v1251_v20 = vld [vmem:[%s3146_s5 + $0x68] sm:$0xff] }
 0x101   : > { %782 = vmatpush1.msra.mxu1 %v1823_v16  ;;  %912 = vmatprep.subr.mxu0 %v1850_v22  ;;  %v1253_v16 = vld [vmem:[%s3146_s5 + $0x78] sm:$0xff]  ;;  %v1268_v17 = vld [vmem:[%s3146_s5 + $0xf0] sm:$0xff]  ;;  %v1250_v22 = vld [vmem:[%s3146_s5 + $0x60] sm:$0xff] }
 0x102   : > { %783 = vmatprep.subr.mxu1 %v1822_v18  ;;  %913 = vmatpush1.msra.mxu0 %v1849_v24  ;;  %v1267_v18 = vld [vmem:[%s3146_s5 + $0xe8] sm:$0xff]  ;;  %v1249_v24 = vld [vmem:[%s3146_s5 + $0x58] sm:$0xff] }
 0x103   : > { %784 = vmatpush1.msra.mxu1 %v1821_v21  ;;  %914 = vmatprep.subr.mxu0 %v1848_v26  ;;  %v1266_v21 = vld [vmem:[%s3146_s5 + $0xe0] sm:$0xff]  ;;  %v1264_v26 = vld [vmem:[%s3146_s5 + $0xd0] sm:$0xff] }
 0x104   : > { %785 = vmatprep.subr.mxu1 %v1820_v23  ;;  %915 = vmatpush1.msra.mxu0 %v1847_v28  ;;  %v1265_v23 = vld [vmem:[%s3146_s5 + $0xd8] sm:$0xff]  ;;  %v1248_v28 = vld [vmem:[%s3146_s5 + $0x50] sm:$0xff] }
 0x105   : > { %786 = vmatpush1.msra.mxu1 %v1819_v25  ;;  %916 = vmatprep.subr.mxu0 %v1846_v31  ;;  %v1942_v25 = vld [vmem:[%s3146_s5 + $0x1f8] sm:$0xff]  ;;  %v1263_v31 = vld [vmem:[%s3146_s5 + $0xc8] sm:$0xff] }
 0x106   : > { %787 = vmatprep.subr.mxu1 %v1818_v27  ;;  %917 = vmatpush1.msra.mxu0 %v1845_v33  ;;  %v1926_v27 = vld [vmem:[%s3146_s5 + $0x178] sm:$0xff]  ;;  %v1247_v33 = vld [vmem:[%s3146_s5 + $0x48] sm:$0xff] }
 0x107   : > { %788 = vmatpush1.msra.mxu1 %v1817_v29  ;;  %950 = vmatprep.mubr.f32.mxu0 %v2168_v1  ;;  %v1941_v29 = vld [vmem:[%s3146_s5 + $0x1f0] sm:$0xff] }
 0x108   : > { %789 = vmatprep.subr.mxu1 %v1816_v32  ;;  %951 = vmatmul.mubr.f32.vlgmr.msra.gmra.mxu0 %v850_v37  ;;  %v1925_v32 = vld [vmem:[%s3146_s5 + $0x170] sm:$0xff]  ;;  %v1246_v37 = vld [vmem:[%s3146_s5 + $0x40] sm:$0xff] }
 0x109   : > { %790 = vmatpush1.msra.mxu1 %v1815_v34  ;;  %825 = vmatprep.mubr.f32.mxu1 %v2168_v1  ;;  %v1940_v34 = vld [vmem:[%s3146_s5 + $0x1e8] sm:$0xff] }
 0x10a   : > { %791 = vmatprep.subr.mxu1 %v1814_v35  ;;  %956 = vmatprep.mubr.f32.mxu0 %v2168_v1  ;;  %v1262_v35 = vld [vmem:[%s3146_s5 + $0xc0] sm:$0xff] }
 0x10b   : > { %792 = vmatpush1.msra.mxu1 %v1813_v36  ;;  %1986 = vmatprep.subr.mxu0 %v1942_v25  ;;  %v1924_v36 = vld [vmem:[%s3146_s5 + $0x168] sm:$0xff] }
 0x10c   : > { %826 = vmatmul.mubr.f32.vlgmr.msra.gmra.mxu1 %v725_v39  ;;  %1011 = vmatprep.subr.mxu1 %v1908_v38  ;;  %v1939_v38 = vld [vmem:[%s3146_s5 + $0x1e0] sm:$0xff]  ;;  %v1261_v39 = vld [vmem:[%s3146_s5 + $0xb8] sm:$0xff] }
 0x10d   : > { %831 = vmatprep.mubr.f32.mxu1 %v2168_v1  ;;  %957 = vmatmul.mubr.f32.gmra.mxu0 %v851_v42  ;;  %v1938_v42 = vld [vmem:[%s3146_s5 + $0x1d8] sm:$0xff] }
 0x10e   : > { %1012 = vmatpush1.msra.mxu1 %v1907_v40  ;;  %962 = vmatprep.mubr.f32.mxu0 %v2168_v1  ;;  %v1923_v40 = vld [vmem:[%s3146_s5 + $0x160] sm:$0xff] }
 0x10f   : > { %1013 = vmatprep.subr.mxu1 %v1906_v41  ;;  %1987 = vmatpush3.msra.mxu0 %v1926_v27  ;;  %v1245_v41 = vld [vmem:[%s3146_s5 + $0x38] sm:$0xff] }
 0x110   : > { %1014 = vmatpush1.msra.mxu1 %v1905_v43  ;;  %1988 = vmatprep.subr.mxu0 %v1941_v29  ;;  %v1260_v43 = vld [vmem:[%s3146_s5 + $0xb0] sm:$0xff] }
 0x111   : > { %832 = vmatmul.mubr.f32.gmra.mxu1 %v726_v46  ;;  %1015 = vmatprep.subr.mxu1 %v1904_v44  ;;  %v1922_v44 = vld [vmem:[%s3146_s5 + $0x158] sm:$0xff]  ;;  %v1937_v46 = vld [vmem:[%s3146_s5 + $0x1d0] sm:$0xff] }
 0x112   : > { %963 = vmatmul.mubr.f32.gmra.mxu0 %v852_v48  ;;  %1016 = vmatpush1.msra.mxu1 %v1903_v45  ;;  %v1244_v45 = vld [vmem:[%s3146_s5 + $0x30] sm:$0xff] }
 0x113   : > { %1017 = vmatprep.subr.mxu1 %v1902_v47  ;;  %837 = vmatprep.mubr.f32.mxu1 %v2168_v1  ;;  %v1259_v47 = vld [vmem:[%s3146_s5 + $0xa8] sm:$0xff]  ;;  %v1921_v48 = vld [vmem:[%s3146_s5 + $0x150] sm:$0xff] }
 0x114   : > { %1018 = vmatpush1.msra.mxu1 %v1901_v49  ;;  %1989 = vmatpush3.msra.mxu0 %v1925_v32  ;;  %v1243_v49 = vld [vmem:[%s3146_s5 + $0x28] sm:$0xff] }
 0x115   : > { %838 = vmatmul.mubr.f32.gmra.mxu1 %v727_v52  ;;  %1019 = vmatprep.subr.mxu1 %v1900_v50  ;;  %v1936_v50 = vld [vmem:[%s3146_s5 + $0x1c8] sm:$0xff] }
 0x116   : > { %1020 = vmatpush1.msra.mxu1 %v1899_v51  ;;  %1075 = vmatprep.mubr.f32.mxu1 %v2168_v1  ;;  %v1258_v51 = vld [vmem:[%s3146_s5 + $0xa0] sm:$0xff]  ;;  %v1920_v52 = vld [vmem:[%s3146_s5 + $0x148] sm:$0xff] }
 0x117   : > { %1021 = vmatprep.subr.mxu1 %v1898_v53  ;;  %1990 = vmatprep.subr.mxu0 %v1940_v34  ;;  %v1242_v53 = vld [vmem:[%s3146_s5 + $0x20] sm:$0xff] }
 0x118   : > { %1022 = vmatpush1.msra.mxu1 %v1897_v54  ;;  %1991 = vmatpush3.msra.mxu0 %v1924_v36  ;;  %v1935_v54 = vld [vmem:[%s3146_s5 + $0x1c0] sm:$0xff] }
 0x119   : > { %1023 = vmatprep.subr.mxu1 %v1896_v55  ;;  %1992 = vmatprep.subr.mxu0 %v1939_v38  ;;  %v1257_v55 = vld [vmem:[%s3146_s5 + $0x98] sm:$0xff] }
 0x11a   : > { %1024 = vmatpush1.msra.mxu1 %v1895_v56  ;;  %1993 = vmatpush3.msra.mxu0 %v1923_v40  ;;  %v1919_v56 = vld [vmem:[%s3146_s5 + $0x140] sm:$0xff] }
 0x11b   : > { %1025 = vmatprep.subr.mxu1 %v1894_v57  ;;  %1994 = vmatprep.subr.mxu0 %v1938_v42  ;;  %v1241_v57 = vld [vmem:[%s3146_s5 + $0x18] sm:$0xff] }
 0x11c   : > { %1026 = vmatpush1.msra.mxu1 %v1893_v58  ;;  %1995 = vmatpush3.msra.mxu0 %v1922_v44  ;;  %v1934_v58 = vld [vmem:[%s3146_s5 + $0x1b8] sm:$0xff] }
 0x11d   : > { %1027 = vmatprep.subr.mxu1 %v1892_v59  ;;  %1996 = vmatprep.subr.mxu0 %v1937_v46  ;;  %v1256_v59 = vld [vmem:[%s3146_s5 + $0x90] sm:$0xff]  ;;  %v2966_v46 = vsub.s32 1, %v2462_v19 }
 0x11e   : > { %1028 = vmatpush1.msra.mxu1 %v1891_v60  ;;  %1997 = vmatpush3.msra.mxu0 %v1921_v48  ;;  %v1918_v60 = vld [vmem:[%s3146_s5 + $0x138] sm:$0xff] }
 0x11f   : > { %1029 = vmatprep.subr.mxu1 %v1890_v61  ;;  %1998 = vmatprep.subr.mxu0 %v1936_v50  ;;  %v1240_v61 = vld [vmem:[%s3146_s5 + $0x10] sm:$0xff] }
 0x120   : > { %1030 = vmatpush1.msra.mxu1 %v1889_v62  ;;  %1999 = vmatpush3.msra.mxu0 %v1920_v52  ;;  %v1933_v62 = vld [vmem:[%s3146_s5 + $0x1b0] sm:$0xff] }
 0x121   : > { %1031 = vmatprep.subr.mxu1 %v1888_v63  ;;  %2000 = vmatprep.subr.mxu0 %v1935_v54  ;;  %v1255_v63 = vld [vmem:[%s3146_s5 + $0x88] sm:$0xff] }
 0x122   : > { %1032 = vmatpush1.msra.mxu1 %v1887_v0  ;;  %2001 = vmatpush3.msra.mxu0 %v1919_v56  ;;  %v1917_v0 = vld [vmem:[%s3146_s5 + $0x130] sm:$0xff] }
 0x123   : > { %1033 = vmatprep.subr.mxu1 %v1886_v2  ;;  %2002 = vmatprep.subr.mxu0 %v1934_v58  ;;  %v1239_v2 = vld [vmem:[%s3146_s5 + $0x8] sm:$0xff] }
 0x124   : > { %1034 = vmatpush1.msra.mxu1 %v1885_v3  ;;  %2003 = vmatpush3.msra.mxu0 %v1918_v60  ;;  %v1932_v3 = vld [vmem:[%s3146_s5 + $0x1a8] sm:$0xff] }
 0x125   : > { %1035 = vmatprep.subr.mxu1 %v1884_v4  ;;  %2004 = vmatprep.subr.mxu0 %v1933_v62  ;;  %v1254_v4 = vld [vmem:[%s3146_s5 + $0x80] sm:$0xff] }
 0x126   : > { %1036 = vmatpush1.msra.mxu1 %v1883_v5  ;;  %2005 = vmatpush3.msra.mxu0 %v1917_v0  ;;  %v1916_v5 = vld [vmem:[%s3146_s5 + $0x128] sm:$0xff] }
 0x127   : > { %1037 = vmatprep.subr.mxu1 %v1882_v6  ;;  %2006 = vmatprep.subr.mxu0 %v1932_v3  ;;  %v1238_v6 = vld [vmem:[%s3146_s5] sm:$0xff] }
 0x128   : > { %1038 = vmatpush1.msra.mxu1 %v1881_v7  ;;  %2007 = vmatpush3.msra.mxu0 %v1916_v5  ;;  %v1931_v7 = vld [vmem:[%s3146_s5 + $0x1a0] sm:$0xff] }
 0x129   : > { %1039 = vmatprep.subr.mxu1 %v1880_v8  ;;  %2008 = vmatprep.subr.mxu0 %v1931_v7  ;;  %v1915_v8 = vld [vmem:[%s3146_s5 + $0x120] sm:$0xff] }
 0x12a   : > { %1040 = vmatpush1.msra.mxu1 %v1879_v9  ;;  %2009 = vmatpush3.msra.mxu0 %v1915_v8  ;;  %v1930_v9 = vld [vmem:[%s3146_s5 + $0x198] sm:$0xff] }
 0x12b   : > { %1041 = vmatprep.subr.mxu1 %v1878_v10  ;;  %2010 = vmatprep.subr.mxu0 %v1930_v9  ;;  %v1914_v10 = vld [vmem:[%s3146_s5 + $0x118] sm:$0xff] }
 0x12c   : > { %1042 = vmatpush1.msra.mxu1 %v1877_v11  ;;  %v1929_v11 = vld [vmem:[%s3146_s5 + $0x190] sm:$0xff]  ;;  %2011 = vmatpush3.msra.mxu0 %v1914_v10 }
 0x12d   : > { %1076 = vmatmul.mubr.f32.vlgmr.msra.gmra.mxu1 %v975_v12  ;;  %2024 = vmatprep.subr.mxu1 %v1269_v15  ;;  %v1913_v12 = vld [vmem:[%s3146_s5 + $0x110] sm:$0xff]  ;;  %v1927_v15 = vld [vmem:[%s3146_s5 + $0x180] sm:$0xff] }
 0x12e   : > { %1081 = vmatprep.mubr.f32.mxu1 %v2168_v1  ;;  %2025 = vmatpush3.msra.mxu1 %v1253_v16  ;;  %v1911_v16 = vld [vmem:[%s3146_s5 + $0x100] sm:$0xff] }
 0x12f   : > { %2026 = vmatprep.subr.mxu1 %v1268_v17  ;;  %2012 = vmatprep.subr.mxu0 %v1929_v11  ;;  %v1974_v17 = vld [vmem:[%s3146_s5 + $0x2f8] sm:$0xff] }
 0x130   : > { %2013 = vmatpush3.msra.mxu0 %v1913_v12 }
 0x131   : > { %1082 = vmatmul.mubr.f32.gmra.mxu1 %v976_v13  ;;  %v1928_v13 = vld [vmem:[%s3146_s5 + $0x188] sm:$0xff] }
 0x132   : > { %1087 = vmatprep.mubr.f32.mxu1 %v2168_v1  ;;  %v1252_v1 = vld [vmem:[%s3146_s5 + $0x70] sm:$0xff]  ;;  %2014 = vmatprep.subr.mxu0 %v1928_v13 }
 0x133   : > { %2027 = vmatpush3.msra.mxu1 %v1252_v1 }
 0x134   : > { %2028 = vmatprep.subr.mxu1 %v1267_v18 }
 0x135   : > { %1088 = vmatmul.mubr.f32.gmra.mxu1 %v977_v14  ;;  %v1912_v14 = vld [vmem:[%s3146_s5 + $0x108] sm:$0xff] }
 0x136   : > { %2029 = vmatpush3.msra.mxu1 %v1251_v20  ;;  %2015 = vmatpush3.msra.mxu0 %v1912_v14 }
 0x137   : > { %2030 = vmatprep.subr.mxu1 %v1266_v21  ;;  %2016 = vmatprep.subr.mxu0 %v1927_v15 }
 0x138   : > { %2031 = vmatpush3.msra.mxu1 %v1250_v22  ;;  %2017 = vmatpush3.msra.mxu0 %v1911_v16 }
 0x139   : > { %2032 = vmatprep.subr.mxu1 %v1265_v23  ;;  %2062 = vmatprep.subr.mxu0 %v1974_v17 }
 0x13a   : > { %2033 = vmatpush3.msra.mxu1 %v1249_v24 }
 0x13b   : > { %2034 = vmatprep.subr.mxu1 %v1264_v26 }
 0x13c   : > { %2035 = vmatpush3.msra.mxu1 %v1248_v28 }
 0x13d   : > { %2036 = vmatprep.subr.mxu1 %v1263_v31 }
 0x13e   : > { %2037 = vmatpush3.msra.mxu1 %v1247_v33 }
 0x13f   : > { %2038 = vmatprep.subr.mxu1 %v1262_v35 }
 0x140   : > { %2039 = vmatpush3.msra.mxu1 %v1246_v37 }
 0x141   : > { %2040 = vmatprep.subr.mxu1 %v1261_v39 }
 0x142   : > { %2041 = vmatpush3.msra.mxu1 %v1245_v41  ;;  %v2960_v41 = vsub.s32 0, %v2462_v19 }
 0x143   : > { %2042 = vmatprep.subr.mxu1 %v1260_v43  ;;  %v1100_v43 = vld [vmem:[%s3145_s4] sm:$0x3] }
 0x144   : > { %2043 = vmatpush3.msra.mxu1 %v1244_v45  ;;  %v1109_v58 = vrot.slane %v1100_v43, %v2966_v46 }
 0x145   : > { %2044 = vmatprep.subr.mxu1 %v1259_v47 }
 0x146   : > { %2045 = vmatpush3.msra.mxu1 %v1243_v49 }
 0x147   : > { %2046 = vmatprep.subr.mxu1 %v1258_v51  ;;  %v1105_v51 = vrot.slane %v1100_v43, %v2960_v41 }
 0x148   : > { %2047 = vmatpush3.msra.mxu1 %v1242_v53 }
 0x149   : > { %2048 = vmatprep.subr.mxu1 %v1257_v55 }
 0x14a   : > { %2049 = vmatpush3.msra.mxu1 %v1241_v57 }
 0x14b   : > { %2050 = vmatprep.subr.mxu1 %v1256_v59 }
 0x14c   : > { %2051 = vmatpush3.msra.mxu1 %v1240_v61 }
 0x14d   : > { %2052 = vmatprep.subr.mxu1 %v1255_v63 }
 0x14e   : > { %2053 = vmatpush3.msra.mxu1 %v1239_v2 }
 0x14f   : > { %2054 = vmatprep.subr.mxu1 %v1254_v4 }
 0x150   : > { %2055 = vmatpush3.msra.mxu1 %v1238_v6 }
 0x1a3   : > { %v708_v20 = vpop.f32.mrf.mxu0 }
 0x1a5   : > { %v710_v22 = vpop.f32.mrf.mxu0 }
 0x1a7   : > { %v714_v25 = vpop.f32.mrf.mxu0 }
 0x1a9   : > { %v716_v27 = vpop.f32.mrf.mxu0 }
 0x1ab   : > { %v625_v1 = vpop.f32.mrf.mxu1 }
 0x1ac   : > { %v709_v37 = vadd.f32 %v708_v20, %v625_v1 }
 0x1ad   : > { %v627_v18 = vpop.f32.mrf.mxu1 }
 0x1ae   : > { %v711_v39 = vadd.f32 %v710_v22, %v627_v18 }
 0x1b4   : > { %v631_v21 = vpop.f32.mrf.mxu1 }
 0x1b5   : > { %v715_v44 = vadd.f32 %v714_v25, %v631_v21 }
 0x1b6   : > { %v633_v23 = vpop.f32.mrf.mxu1 }
 0x1b7   : > { %v717_v47 = vadd.f32 %v716_v27, %v633_v23 }
 0x1bf   : > { %v720_v29 = vpop.f32.mrf.mxu0 }
 0x1c0   : > { %v637_v24 = vpop.f32.mrf.mxu1 }
 0x1c1   : > { %v722_v32 = vpop.f32.mrf.mxu0  ;;  %v721_v55 = vadd.f32 %v720_v29, %v637_v24 }
 0x1c2   : > { %v639_v26 = vpop.f32.mrf.mxu1 }
 0x1c3   : > { %v723_v59 = vadd.f32 %v722_v32, %v639_v26 }
 0x1c8   : > { %v952_v34 = vpop.f32.mrf.mxu0 }
 0x1ca   : > { %v954_v36 = vpop.f32.mrf.mxu0 }
 0x1cc   : > { %v827_v28 = vpop.f32.mrf.mxu1 }
 0x1cd   : > { %v844_v40 = vadd.f32 %v827_v28, %v709_v37  ;;  %v958_v42 = vpop.f32.mrf.mxu0 }
 0x1ce   : > { %v829_v31 = vpop.f32.mrf.mxu1 }
 0x1cf   : > { %v845_v45 = vadd.f32 %v829_v31, %v711_v39  ;;  %v969_v50 = vadd.f32 %v952_v34, %v844_v40  ;;  %v960_v52 = vpop.f32.mrf.mxu0 }
 0x1d1   : > { %v833_v33 = vpop.f32.mrf.mxu1  ;;  %v970_v57 = vadd.f32 %v954_v36, %v845_v45 }
 0x1d2   : > { %v846_v49 = vadd.f32 %v833_v33, %v715_v44  ;;  %v964_v2 = vpop.f32.mrf.mxu0 }
 0x1d3   : > { %v835_v35 = vpop.f32.mrf.mxu1 }
 0x1d4   : > { %v847_v53 = vadd.f32 %v835_v35, %v717_v47  ;;  %v971_v0 = vadd.f32 %v958_v42, %v846_v49  ;;  %v966_v14 = vpop.f32.mrf.mxu0  ;;  %v1973_v47 = vld [vmem:[%s3146_s5 + $0x2f0] sm:$0xff]  ;;  %v1972_v49 = vld [vmem:[%s3146_s5 + $0x2e8] sm:$0xff] }
 0x1d5   : > { %v839_v38 = vpop.f32.mrf.mxu1 }
 0x1d6   : > { %v848_v61 = vadd.f32 %v839_v38, %v721_v55  ;;  %v972_v4 = vadd.f32 %v960_v52, %v847_v53  ;;  %v1971_v52 = vld [vmem:[%s3146_s5 + $0x2e0] sm:$0xff] }
 0x1d7   : > { %v841_v48 = vpop.f32.mrf.mxu1 }
 0x1d8   : > { %v849_v5 = vadd.f32 %v841_v48, %v723_v59  ;;  %v973_v13 = vadd.f32 %v964_v2, %v848_v61  ;;  %v1957_v48 = vld [vmem:[%s3146_s5 + $0x270] sm:$0xff]  ;;  %v1970_v59 = vld [vmem:[%s3146_s5 + $0x2d8] sm:$0xff] }
 0x1da   : > { %v974_v18 = vadd.f32 %v966_v14, %v849_v5  ;;  %v1952_v5 = vld [vmem:[%s3146_s5 + $0x248] sm:$0xff]  ;;  %v1963_v14 = vld [vmem:[%s3146_s5 + $0x2a0] sm:$0xff] }
 0x1ed   : > { %v1077_v54 = vpop.f32.mrf.mxu1 }
 0x1ee   : > { %v1094_v56 = vadd.f32 %v1077_v54, %v969_v50 }
 0x1ef   : > { %v1079_v60 = vpop.f32.mrf.mxu1 }
 0x1f0   : > { %v1112_v62 = vadd.f32 %v1105_v51, %v1094_v56  ;;  %v1095_v63 = vadd.f32 %v1079_v60, %v970_v57  ;;  %v1955_v56 = vld [vmem:[%s3146_s5 + $0x260] sm:$0xff] }
 0x1f1   : > { %v1083_v3 = vpop.f32.mrf.mxu1 }
 0x1f2   : > { %v1118_v6 = vmax.f32 %v1112_v62, 0.0  ;;  %v1113_v7 = vadd.f32 %v1109_v58, %v1095_v63  ;;  %v1096_v8 = vadd.f32 %v1083_v3, %v971_v0  ;;  %v1954_v63 = vld [vmem:[%s3146_s5 + $0x258] sm:$0xff]  ;;  %v1969_v0 = vld [vmem:[%s3146_s5 + $0x2d0] sm:$0xff] }
 0x1f3   : > { %v1085_v9 = vpop.f32.mrf.mxu1  ;;  %v1953_v3 = vld [vmem:[%s3146_s5 + $0x250] sm:$0xff] }
 0x1f4   : > { %1124 = vst [vmem:[#allocation3] sm:$0xff] %v1118_v6  ;;  %v1119_v10 = vmax.f32 %v1113_v7, 0.0  ;;  %v1114_v11 = vadd.f32 %v1105_v51, %v1096_v8  ;;  %v1097_v12 = vadd.f32 %v1085_v9, %v972_v4  ;;  %v1968_v4 = vld [vmem:[%s3146_s5 + $0x2c8] sm:$0xff]  ;;  %v1951_v7 = vld [vmem:[%s3146_s5 + $0x240] sm:$0xff]  ;;  %v1966_v8 = vld [vmem:[%s3146_s5 + $0x2b8] sm:$0xff] }
 0x1f5   : > { %v1089_v15 = vpop.f32.mrf.mxu1  ;;  %v1950_v9 = vld [vmem:[%s3146_s5 + $0x238] sm:$0xff] }
 0x1f6   : > { %1125 = vst [vmem:[#allocation3 + $0x8] sm:$0xff] %v1119_v10  ;;  %v2970_v16 = vmax.f32 %v1114_v11, 0.0  ;;  %v1115_v17 = vadd.f32 %v1109_v58, %v1097_v12  ;;  %v1098_v1 = vadd.f32 %v1089_v15, %v973_v13  ;;  %v1949_v11 = vld [vmem:[%s3146_s5 + $0x230] sm:$0xff]  ;;  %v1964_v12 = vld [vmem:[%s3146_s5 + $0x2a8] sm:$0xff]  ;;  %v1947_v15 = vld [vmem:[%s3146_s5 + $0x220] sm:$0xff] }
 0x1f7   : > { %v1091_v20 = vpop.f32.mrf.mxu1  ;;  %v1948_v13 = vld [vmem:[%s3146_s5 + $0x228] sm:$0xff] }
 0x1f8   : > { %v2972_v21 = vmax.f32 %v1115_v17, 0.0  ;;  %v1116_v22 = vadd.f32 %v1105_v51, %v1098_v1  ;;  %v1099_v23 = vadd.f32 %v1091_v20, %v974_v18  ;;  %v1315_v30 = vrot.slane %v2970_v16, 1  ;;  %v1956_v51 = vld [vmem:[%s3146_s5 + $0x268] sm:$0xff]  ;;  %v1962_v17 = vld [vmem:[%s3146_s5 + $0x298] sm:$0xff]  ;;  %v1961_v18 = vld [vmem:[%s3146_s5 + $0x290] sm:$0xff] }
 0x1f9   : > { %v1946_v1 = vld [vmem:[%s3146_s5 + $0x218] sm:$0xff]  ;;  %v1945_v20 = vld [vmem:[%s3146_s5 + $0x210] sm:$0xff] }
 0x1fa   : > { %v1122_v24 = vmax.f32 %v1116_v22, 0.0  ;;  %v1117_v25 = vadd.f32 %v1109_v58, %v1099_v23  ;;  %v1318_v42 = vrot.slane %v2972_v21, 1  ;;  %v1524_v60 = vrot.slane %v2972_v21, 2  ;;  %v1960_v23 = vld [vmem:[%s3146_s5 + $0x288] sm:$0xff] }
 0x1fc   : > { %1128 = vst [vmem:[#allocation3 + $0x20] sm:$0x3] %v1122_v24  ;;  %v1123_v26 = vmax.f32 %v1117_v25, 0.0  ;;  %v1944_v25 = vld [vmem:[%s3146_s5 + $0x208] sm:$0xff] }
 0x1fd   : > { %v1909_v27 = vld [vmem:[#allocation3 + $0x1] ss:$8 sm:$0x3] }
 0x1fe   : > { %v1215_v28 = vrot.slane %v1909_v27, %v2960_v41  ;;  %v1219_v29 = vrot.slane %v1909_v27, %v2966_v46  ;;  %1129 = vst [vmem:[#allocation3 + $0x28] sm:$0x3] %v1123_v26  ;;  %v1959_v26 = vld [vmem:[%s3146_s5 + $0x280] sm:$0xff] }
 0x200   : > { %v1222_v31 = vsel %vm1169_vm4, %v1215_v28, %v1118_v6  ;;  %v1223_v32 = vsel %vm1169_vm4, %v1219_v29, %v1119_v10  ;;  %v1967_v6 = vld [vmem:[%s3146_s5 + $0x2c0] sm:$0xff]  ;;  %v1965_v10 = vld [vmem:[%s3146_s5 + $0x2b0] sm:$0xff] }
 0x201   : > { %1228 = vst [vmem:[#allocation3] sm:$0xff] %v1222_v31  ;;  %1229 = vst [vmem:[#allocation3 + $0x8] sm:$0xff] %v1223_v32  ;;  %1467 = vmatprep.mubr.f32.mxu1 %v1223_v32  ;;  %v1943_v28 = vld [vmem:[%s3146_s5 + $0x200] sm:$0xff]  ;;  %v1521_v32 = vrot.slane %v2970_v16, 2 }
 0x202   : > { %1468 = vmatmul.mubr.f32.vlgmr.msra.gmra.mxu1 %v1222_v31 }
 0x203   : > { %1472 = vmatprep.mubr.f32.mxu1 %v2972_v21  ;;  %v1180_v35 = vld [vmem:[#allocation3 + $0x20] sm:$0x3] }
 0x205   : > { %v1910_v33 = vld [vmem:[#allocation3 + $0x20] ss:$8 sm:$0x3] }
 0x206   : > { %v1192_v34 = vrot.slane %v1910_v33, %v2960_v41  ;;  %v1196_v19 = vrot.slane %v1910_v33, %v2966_v46  ;;  %1473 = vmatmul.mubr.f32.gmra.mxu1 %v2970_v16  ;;  %v1181_v36 = vld [vmem:[#allocation3 + $0x28] sm:$0x3]  ;;  %v1958_v46 = vld [vmem:[%s3146_s5 + $0x278] sm:$0xff] }
 0x208   : > { %v1203_v37 = vsel %vm1175_vm5, %v1192_v34, %v1180_v35  ;;  %v1204_v38 = vsel %vm1175_vm5, %v1196_v19, %v1181_v36  ;;  %v1271_v39 = vld [vmem:[#allocation3 + $0x8] sm:$0xfe]  ;;  %v1270_v40 = vld [vmem:[#allocation3] sm:$0xfe] }
 0x209   : > { %1232 = vst [vmem:[#allocation3 + $0x20] sm:$0x3] %v1203_v37  ;;  %1233 = vst [vmem:[#allocation3 + $0x28] sm:$0x3] %v1204_v38  ;;  %v1317_v43 = vrot.slane %v1271_v39, 1  ;;  %v1314_v44 = vrot.slane %v1270_v40, 1 }
 0x20a   : > { %v1479_v50 = vld [vmem:[#allocation3 + $0x8] sm:$0xfc]  ;;  %v1478_v22 = vld [vmem:[#allocation3] sm:$0xfc] }
 0x20b   : > { %v1319_v41 = vsel %vm1313_vm6, %v1317_v43, %v1318_v42  ;;  %v1316_v45 = vsel %vm1313_vm6, %v1314_v44, %v1315_v30  ;;  %v1523_v58 = vrot.slane %v1479_v50, 2  ;;  %v1520_v27 = vrot.slane %v1478_v22, 2 }
 0x20c   : > { %1392 = vmatprep.mubr.f32.mxu0 %v1319_v41 }
 0x20d   : > { %1393 = vmatmul.mubr.f32.vlgmr.msra.gmra.mxu0 %v1316_v45  ;;  %v1525_v2 = vsel %vm1519_vm7, %v1523_v58, %v1524_v60  ;;  %v1522_v33 = vsel %vm1519_vm7, %v1520_v27, %v1521_v32 }
 0x20e   : > { %2063 = vmatpush3.msra.mxu0 %v1958_v46 }
 0x20f   : > { %2064 = vmatprep.subr.mxu0 %v1973_v47 }
 0x210   : > { %2065 = vmatpush3.msra.mxu0 %v1957_v48  ;;  %v1273_v53 = vld [vmem:[#allocation3 + $0x28] sm:$0x1]  ;;  %v1272_v54 = vld [vmem:[#allocation3 + $0x20] sm:$0x1] }
 0x211   : > { %2066 = vmatprep.subr.mxu0 %v1972_v49  ;;  %v1322_v55 = vrot.slane %v1273_v53, 1  ;;  %v1320_v57 = vrot.slane %v1272_v54, 1  ;;  %v1481_v24 = vld [vmem:[#allocation3 + $0x28] sm:$0x3]  ;;  %v1480_v31 = vld [vmem:[#allocation3 + $0x20] sm:$0x3] }
 0x212   : > { %2067 = vmatpush3.msra.mxu0 %v1956_v51  ;;  %v1528_v29 = vrot.slane %v1481_v24, 2  ;;  %v1526_v34 = vrot.slane %v1480_v31, 2  ;;  %v1975_v49 = vld [vmem:[%s3147_s6] ss:$0 sm:$0xff] }
 0x213   : > { %2068 = vmatprep.subr.mxu0 %v1971_v52  ;;  %v1323_v61 = vsel %vm1313_vm6, %v1318_v42, %v1322_v55  ;;  %v1321_v62 = vsel %vm1313_vm6, %v1315_v30, %v1320_v57 }
 0x214   : > { %1397 = vmatprep.mubr.f32.mxu0 %v1323_v61  ;;  %2069 = vmatpush3.msra.mxu0 %v1955_v56  ;;  %v1529_v19 = vsel %vm1519_vm7, %v1524_v60, %v1528_v29  ;;  %v1527_v35 = vsel %vm1519_vm7, %v1521_v32, %v1526_v34 }
 0x215   : > { %1398 = vmatmul.mubr.f32.gmra.mxu0 %v1321_v62  ;;  %2070 = vmatprep.subr.mxu0 %v1970_v59 }
 0x216   : > { %2071 = vmatpush3.msra.mxu0 %v1954_v63  ;;  %1598 = vmatprep.mubr.f32.mxu0 %v1525_v2 }
 0x217   : > { %2072 = vmatprep.subr.mxu0 %v1969_v0 }
 0x218   : > { %2073 = vmatpush3.msra.mxu0 %v1953_v3 }
 0x219   : > { %2074 = vmatprep.subr.mxu0 %v1968_v4 }
 0x21a   : > { %2075 = vmatpush3.msra.mxu0 %v1952_v5 }
 0x21b   : > { %2076 = vmatprep.subr.mxu0 %v1967_v6 }
 0x21c   : > { %2077 = vmatpush3.msra.mxu0 %v1951_v7 }
 0x21d   : > { %2078 = vmatprep.subr.mxu0 %v1966_v8 }
 0x21e   : > { %2079 = vmatpush3.msra.mxu0 %v1950_v9 }
 0x21f   : > { %2080 = vmatprep.subr.mxu0 %v1965_v10 }
 0x220   : > { %2081 = vmatpush3.msra.mxu0 %v1949_v11 }
 0x221   : > { %2082 = vmatprep.subr.mxu0 %v1964_v12 }
 0x222   : > { %2083 = vmatpush3.msra.mxu0 %v1948_v13 }
 0x223   : > { %2084 = vmatprep.subr.mxu0 %v1963_v14 }
 0x224   : > { %2085 = vmatpush3.msra.mxu0 %v1947_v15 }
 0x225   : > { %2086 = vmatprep.subr.mxu0 %v1962_v17 }
 0x226   : > { %2087 = vmatpush3.msra.mxu0 %v1946_v1 }
 0x227   : > { %2088 = vmatprep.subr.mxu0 %v1961_v18 }
 0x228   : > { %2089 = vmatpush3.msra.mxu0 %v1945_v20 }
 0x229   : > { %2090 = vmatprep.subr.mxu0 %v1960_v23 }
 0x22a   : > { %2091 = vmatpush3.msra.mxu0 %v1944_v25 }
 0x22b   : > { %2092 = vmatprep.subr.mxu0 %v1959_v26 }
 0x22c   : > { %2093 = vmatpush3.msra.mxu0 %v1943_v28 }
 0x22d   : > { %1599 = vmatmul.mubr.f32.vlgmr.msra.gmra.mxu0 %v1522_v33 }
 0x22e   : > { %1603 = vmatprep.mubr.f32.mxu0 %v1529_v19 }
 0x231   : > { %1604 = vmatmul.mubr.f32.gmra.mxu0 %v1527_v35 }
 0x2c2   : > { %v2056_v37 = vpop.f32.mrf.mxu1 }
 0x2c4   : > { %v2057_v39 = vpop.f32.mrf.mxu1 }
 0x2c5   : > { %v2058_v30 = vadd.f32 %v2057_v39, %v2056_v37 }
 0x2c6   : > { %v2059_v16 = vpop.f32.mrf.mxu1 }
 0x2c8   : > { %v2060_v41 = vpop.f32.mrf.mxu1 }
 0x2c9   : > { %v2061_v50 = vadd.f32 %v2060_v41, %v2059_v16 }
 0x2cd   : > { %v2018_v36 = vpop.f32.mrf.mxu0 }
 0x2cf   : > { %v2019_v38 = vpop.f32.mrf.mxu0 }
 0x2d0   : > { %v2020_v43 = vadd.f32 %v2019_v38, %v2018_v36 }
 0x2d2   : > { %v1470_v46 = vadd.f32 %v2058_v30, %v2020_v43 }
 0x2d5   : > { %v2021_v40 = vpop.f32.mrf.mxu0 }
 0x2d7   : > { %v2022_v42 = vpop.f32.mrf.mxu0 }
 0x2d8   : > { %v2023_v21 = vadd.f32 %v2022_v42, %v2021_v40 }
 0x2da   : > { %v1475_v53 = vadd.f32 %v2061_v50, %v2023_v21 }
 0x2ed   : > { %v2094_v44 = vpop.f32.mrf.mxu0 }
 0x2ef   : > { %v2095_v45 = vpop.f32.mrf.mxu0 }
 0x2f0   : > { %v2096_v47 = vadd.f32 %v2095_v45, %v2094_v44 }
 0x2f1   : > { %v2097_v48 = vpop.f32.mrf.mxu0 }
 0x2f2   : > { %v1609_v51 = vadd.f32 %v2096_v47, %v1470_v46 }
 0x2f3   : > { %v2098_v52 = vpop.f32.mrf.mxu0 }
 0x2f4   : > { %v2099_v54 = vadd.f32 %v2098_v52, %v2097_v48  ;;  %v1618_v55 = vadd.f32 %v1975_v49, %v1609_v51 }
 0x2f6   : > { %v1610_v56 = vadd.f32 %v2099_v54, %v1475_v53  ;;  %v1620_v57 = vmax.f32 %v1618_v55, 0.0 }
 0x2f8   : > { %1622 = vxpose.xlu0.b32.start [1/2] (short) %v1620_v57, 128  ;;  %v1619_v58 = vadd.f32 %v1975_v49, %v1610_v56 }
 0x2fa   : > { %v1621_v59 = vmax.f32 %v1619_v58, 0.0 }
 0x2fc   : > { %1623 = vxpose.xlu0.b32.end [2/2] (short) %v1621_v59, 128 }
 0x374   : > { %v1638_v60 = vpop.trf.xlu0 }
 0x375   : > { %1655 = vst.msk [vmem:[%s3098_s29] sm:$0xff] %vm1654_vm8, %v1638_v60 }
 0x378   : > { %v1639_v61 = vpop.trf.xlu0 }
 0x379   : > { %1656 = vst.msk [vmem:[%s3098_s29 + $0x8] sm:$0xff] %vm1654_vm8, %v1639_v61 }
 0x37c   : > { %v1640_v62 = vpop.trf.xlu0 }
 0x37d   : > { %1657 = vst.msk [vmem:[%s3098_s29 + $0x10] sm:$0xff] %vm1654_vm8, %v1640_v62 }
 0x380   : > { %v1641_v63 = vpop.trf.xlu0 }
 0x381   : > { %1658 = vst.msk [vmem:[%s3098_s29 + $0x18] sm:$0xff] %vm1654_vm8, %v1641_v63 }
 0x384   : > { %v1642_v0 = vpop.trf.xlu0 }
 0x385   : > { %1659 = vst.msk [vmem:[%s3098_s29 + $0x20] sm:$0xff] %vm1654_vm8, %v1642_v0 }
 0x388   : > { %v1643_v2 = vpop.trf.xlu0 }
 0x389   : > { %1660 = vst.msk [vmem:[%s3098_s29 + $0x28] sm:$0xff] %vm1654_vm8, %v1643_v2 }
 0x38c   : > { %v1644_v3 = vpop.trf.xlu0 }
 0x38d   : > { %1661 = vst.msk [vmem:[%s3098_s29 + $0x30] sm:$0xff] %vm1654_vm8, %v1644_v3 }
 0x390   : > { %v1645_v4 = vpop.trf.xlu0 }
 0x391   : > { %1662 = vst.msk [vmem:[%s3098_s29 + $0x38] sm:$0xff] %vm1654_vm8, %v1645_v4 }
 0x394   : > { %v1646_v5 = vpop.trf.xlu0 }
 0x395   : > { %1663 = vst.msk [vmem:[%s3098_s29 + $0x40] sm:$0xff] %vm1654_vm8, %v1646_v5 }
 0x398   : > { %v1647_v6 = vpop.trf.xlu0 }
 0x399   : > { %1664 = vst.msk [vmem:[%s3098_s29 + $0x48] sm:$0xff] %vm1654_vm8, %v1647_v6 }
 0x39c   : > { %v1648_v7 = vpop.trf.xlu0 }
 0x39d   : > { %1665 = vst.msk [vmem:[%s3098_s29 + $0x50] sm:$0xff] %vm1654_vm8, %v1648_v7 }
 0x3a0   : > { %v1649_v8 = vpop.trf.xlu0 }
 0x3a1   : > { %1666 = vst.msk [vmem:[%s3098_s29 + $0x58] sm:$0xff] %vm1654_vm8, %v1649_v8 }
 0x3a4   : > { %v1650_v9 = vpop.trf.xlu0 }
 0x3a5   : > { %1667 = vst.msk [vmem:[%s3098_s29 + $0x60] sm:$0xff] %vm1654_vm8, %v1650_v9 }
 0x3a8   : > { %v1651_v10 = vpop.trf.xlu0 }
 0x3a9   : > { %1668 = vst.msk [vmem:[%s3098_s29 + $0x68] sm:$0xff] %vm1654_vm8, %v1651_v10 }
 0x3ac   : > { %v1652_v11 = vpop.trf.xlu0 }
 0x3ad   : > { %1669 = vst.msk [vmem:[%s3098_s29 + $0x70] sm:$0xff] %vm1654_vm8, %v1652_v11 }
 0x3b0   : > { %v1653_v12 = vpop.trf.xlu0 }
 0x3b1   : > { %1670 = vst.msk [vmem:[%s3098_s29 + $0x78] sm:$0xff] %vm1654_vm8, %v1653_v12 }
 0x3b2 PF: > { %s17_s26 = sadd.s32 1, %s2166_s26   ;;  %s3149_s24 = smov %s2162_s25 }
 0x3b3   : > { %p14_p5 = scmp.ge.s32.totalorder %s17_s26, 4   ;;  %s3150_s25 = smov %s3152_s27 }
 0x3b5   :  { %16 = sbr.rel (!%p14_p5) target bundleno = 2 (0x2), region = 96 }

</bundles_post_ra>
